<compile_context>
chip_gen: v6e
topology: v6e:2x2x1
jax: 0.10.0
libtpu: 0.0.40
codegen_flags: <defaults>
</compile_context>

<pallas_src>
import functools
import math

import numpy as np
import jax
import jax.numpy as jnp
from jax.experimental import pallas as pl
from jax.experimental.pallas import tpu as pltpu

# ----------------------------- model config (small) -----------------------------
B = 2            # batch
S = 8            # sequence length
D = 32           # hidden_size
H = 2            # n_heads
C = 32           # cond_dim
V = 64           # vocab_size
N_BLOCKS = 2
MLP_RATIO = 4
FREQ_EMB = 256   # TimestepEmbedder.frequency_embedding_size
DH = D // H      # head dim
DR = DH // 2     # rotary width per head (= d_rot in the PyTorch reference)
LN_EPS = 1e-5
V_PAD = 128      # logits padded to a lane-dense width; sliced back to V outside
NEG_INF = -1e30


# ----------------------------- RoPE layout helpers -----------------------------
def rope_permutation():
    """Column permutation + sign so rotate_half becomes one lane roll by D//2.

    New lane layout: [x-halves of all heads | head-0 pass dims | y-halves of all
    heads | head-1 pass dims].  Every rotate_half pair (i, i+DR/2) of every head ends
    up exactly D/2 lanes apart, so a single full-width roll fetches the partner for
    every rotary lane (pass lanes have sin == 0, so their rolled value is irrelevant).
    """
    half = DR // 2
    lower, upper = [], []
    for h in range(H):
        base = h * DH
        lower += [base + i for i in range(half)]             # x-halves
        upper += [base + half + i for i in range(half)]      # aligned y-half partners
    pass_dims = [h * DH + i for h in range(H) for i in range(DR, DH)]
    n_rot = H * half
    n_pass_lower = D // 2 - n_rot
    lower += pass_dims[:n_pass_lower]
    upper += pass_dims[n_pass_lower:]
    perm = np.array(lower + upper, dtype=np.int32)
    sign = np.ones((D,), np.float32)
    sign[:n_rot] = -1.0                                       # x-half lanes need -partner
    return perm, sign


def rotary_tables_full(seq_len):
    # Original-layout (S, D) cos/sin reproducing the PyTorch Rotary cache plus the
    # apply_rotary_pos_emb slicing: DR distinct frequencies on the first DR dims of
    # each head (cat(freqs, freqs)[..., :d_rot]), identity (cos=1, sin=0) elsewhere.
    inv_freq = 1.0 / (10000.0 ** (jnp.arange(0, DH, 2, dtype=jnp.float32) / DH))  # (DR,)
    t = jnp.arange(seq_len, dtype=jnp.float32)
    freqs = t[:, None] * inv_freq[None, :]                        # (S, DR)
    ones = jnp.ones((seq_len, DH - DR), jnp.float32)
    zeros = jnp.zeros((seq_len, DH - DR), jnp.float32)
    cos_head = jnp.concatenate([jnp.cos(freqs), ones], axis=-1)   # (S, DH)
    sin_head = jnp.concatenate([jnp.sin(freqs), zeros], axis=-1)
    return jnp.tile(cos_head, (1, H)), jnp.tile(sin_head, (1, H))


# ----------------------------- in-kernel helpers -----------------------------
def _layernorm(x, w):
    # F.layer_norm(x, [dim]) (no affine), then * weight (no bias)
    mu = jnp.mean(x, axis=-1, keepdims=True)
    var = jnp.mean((x - mu) ** 2, axis=-1, keepdims=True)
    return (x - mu) * jax.lax.rsqrt(var + LN_EPS) * w


def _gelu_tanh(x):
    c = math.sqrt(2.0 / math.pi)
    return 0.5 * x * (1.0 + jnp.tanh(c * (x + 0.044715 * x * x * x)))


# ----------------------------- fused DIT kernel -----------------------------
def dit_fused_kernel(x_ref, modb_ref, modf_ref, cos_ref, sinsign_ref,
                     hqk_ref, hv_ref, bmask_ref,
                     ln1_ref, wq_ref, wk_ref, wv_ref, wo_ref, ln2_ref,
                     w1_ref, b1_ref, w2_ref, b2_ref,
                     lnf_ref, linw_ref, linb_ref,
                     o_ref, *, n_heads, n_blocks, head_dim):
    x = x_ref[...]                                   # (B*S, D) f32 residual stream
    rows, d = x.shape
    inv_sqrt_dh = 1.0 / math.sqrt(head_dim)

    cos = cos_ref[...]                               # (B*S, D), permuted rotary layout
    sinsign = sinsign_ref[...]                       # sin * (+-1 rotate_half sign)
    bmask = bmask_ref[...]                           # (B*S, B*S) additive batch mask

    def rope(t):
        # rotate_half == lane roll by D//2 in the permuted layout (XLU slot), the
        # +-1 sign is pre-folded into sinsign (VPU).  No MXU matmul.
        return t * cos + pltpu.roll(t, shift=d // 2, axis=1) * sinsign

    for blk in range(n_blocks):                      # all blocks fused; x stays on-chip
        shift_msa = modb_ref[blk, 0]
        scale_msa = modb_ref[blk, 1]
        gate_msa = modb_ref[blk, 2]
        shift_mlp = modb_ref[blk, 3]
        scale_mlp = modb_ref[blk, 4]
        gate_mlp = modb_ref[blk, 5]

        # ---- attention branch ----
        h = _layernorm(x, ln1_ref[blk])
        h = h * (1.0 + scale_msa) + shift_msa                    # modulate_fused
        hb = h.astype(jnp.bfloat16)                              # bf16 only at MXU boundary
        q = jnp.dot(hb, wq_ref[blk], preferred_element_type=jnp.float32)
        k = jnp.dot(hb, wk_ref[blk], preferred_element_type=jnp.float32)
        v = jnp.dot(hb, wv_ref[blk], preferred_element_type=jnp.float32)
        q = rope(q)
        k = rope(k)
        # (v untouched: the PyTorch Rotary cache sets cos=1 / sin=0 on the v slot)

        attn = jnp.zeros((rows, d), jnp.float32)
        for hh in range(n_heads):
            # full-width masked matmuls: lane-dense, no tiny slices.
            # TODO(synk): at real sizes (head_dim a multiple of 128) switch to true
            # per-head lane slices; masking costs H x the necessary MXU flops.
            qm = q * hqk_ref[hh:hh + 1] * inv_sqrt_dh
            sc = jax.lax.dot_general(qm, k, (((1,), (1,)), ((), ())),
                                     preferred_element_type=jnp.float32)  # (BS, BS)
            sc = sc + bmask                                       # block-diagonal batch mask
            sc = sc - jnp.max(sc, axis=-1, keepdims=True)
            p = jnp.exp(sc)
            p = p / jnp.sum(p, axis=-1, keepdims=True)            # exact divide
            vm = v * hv_ref[hh:hh + 1]
            attn = attn + jnp.dot(p, vm, preferred_element_type=jnp.float32)

        attn = jnp.dot(attn.astype(jnp.bfloat16), wo_ref[blk],
                       preferred_element_type=jnp.float32)
        x = x + gate_msa * attn            # bias_dropout_add_scale (inference: no dropout)

        # ---- MLP branch ----
        h2 = _layernorm(x, ln2_ref[blk])
        h2 = h2 * (1.0 + scale_mlp) + shift_mlp
        h2 = jnp.dot(h2.astype(jnp.bfloat16), w1_ref[blk],
                     preferred_element_type=jnp.float32) + b1_ref[blk]
        h2 = _gelu_tanh(h2)
        h2 = jnp.dot(h2.astype(jnp.bfloat16), w2_ref[blk],
                     preferred_element_type=jnp.float32) + b2_ref[blk]
        x = x + gate_mlp * h2

    # ---- final layer: adaLN + LayerNorm + linear head (lane-dense V_PAD output) ----
    h = _layernorm(x, lnf_ref[...])
    h = h * (1.0 + modf_ref[1]) + modf_ref[0]                     # shift=modf[0], scale=modf[1]
    out = jnp.dot(h.astype(jnp.bfloat16), linw_ref[...],
                  preferred_element_type=jnp.float32) + linb_ref[...]
    o_ref[...] = out


# ----------------------------- pallas_call wrapper -----------------------------
def run_dit_fused(x_rows, mod_rows, modf_rows, cos_rows, sinsign_rows,
                  hmask_qk, hmask_v, batch_mask, wp):
    rows, d = x_rows.shape
    nb = wp["ln1_w"].shape[0]
    vpad = wp["lin_w"].shape[-1]
    args = (x_rows, mod_rows, modf_rows, cos_rows, sinsign_rows,
            hmask_qk, hmask_v, batch_mask,
            wp["ln1_w"], wp["wq"], wp["wk"], wp["wv"], wp["wo"], wp["ln2_w"],
            wp["w1"], wp["b1"], wp["w2"], wp["b2"],
            wp["lnf_w"], wp["lin_w"], wp["lin_b"])

    # advisory cost estimate for XLA's scheduler around the custom call
    mm = nb * (2 * rows * d * d * 4                       # qkv + out-proj
               + 2 * rows * d * (MLP_RATIO * d) * 2       # mlp up + down
               + 4 * H * rows * rows * d)                 # masked per-head scores + pv
    mm += 2 * rows * d * vpad                             # final head
    trans = nb * (H * rows * rows + rows * MLP_RATIO * d) + 4 * nb * rows + rows
    bytes_accessed = sum(int(np.prod(a.shape)) * a.dtype.itemsize for a in args)
    bytes_accessed += rows * vpad * 4

    kernel = functools.partial(dit_fused_kernel, n_heads=H, n_blocks=nb, head_dim=DH)
    # TODO(synk): for real DiT sizes, stream blocks over an "arbitrary" grid axis
    # (per-block weight BlockSpecs, residual carried in VMEM scratch, init/store via
    # pl.when) and set vmem_limit_bytes explicitly for v7x's 64 MiB VMEM.
    # TODO(synk): on v7x add a 2-way core-parallel split (pl.core_map over a 2-TC
    # mesh) so both TensorCores get work; on single-TC v5e/v6e this gridless single
    # invocation avoids per-step pipeline overhead.
    return pl.pallas_call(
        kernel,
        out_shape=jax.ShapeDtypeStruct((rows, vpad), jnp.float32),
        in_specs=[pl.BlockSpec(memory_space=pltpu.MemorySpace.VMEM) for _ in args],
        out_specs=pl.BlockSpec(memory_space=pltpu.MemorySpace.VMEM),
        cost_estimate=pl.CostEstimate(flops=int(mm), transcendentals=int(trans),
                                      bytes_accessed=int(bytes_accessed)),
    )(*args)


# ----------------------------- plain-JAX glue -----------------------------
def silu(x):
    return x * jax.nn.sigmoid(x)


def timestep_embedding(t, dim):
    half = dim // 2
    freqs = jnp.exp(-math.log(10000.0) * jnp.arange(half, dtype=jnp.float32) / half)
    args = t[:, None].astype(jnp.float32) * freqs[None, :]
    return jnp.concatenate([jnp.cos(args), jnp.sin(args)], axis=-1)


def sigma_map(sigma, p):
    t_freq = timestep_embedding(sigma, FREQ_EMB)
    h = silu(t_freq @ p["t_w1"] + p["t_b1"])
    t_emb = h @ p["t_w2"] + p["t_b2"]
    return silu(t_emb)   # outer F.silu in DIT.forward


@jax.jit
def dit_forward(indices, sigma, params):
    b, s = indices.shape
    rows = b * s
    x = jnp.take(params["vocab_embed"], indices, axis=0).reshape(rows, D)   # (B*S, D)
    c = sigma_map(sigma, params)                                            # (B, C)
    blocks = params["blocks"]
    nb = blocks["ada_w"].shape[0]

    # Hoisted adaLN modulation, expanded to per-row tensors: (N_BLOCKS, 6, B*S, D)
    modb = jnp.einsum("bc,kcm->kbm", c, blocks["ada_w"]) + blocks["ada_b"]
    modb = modb.reshape(nb, b, 6, D).transpose(0, 2, 1, 3)                  # (NB, 6, B, D)
    mod_rows = jnp.broadcast_to(modb[:, :, :, None, :],
                                (nb, 6, b, s, D)).reshape(nb, 6, rows, D)

    final = params["final"]
    modf = (c @ final["ada_w"] + final["ada_b"]).reshape(b, 2, D).transpose(1, 0, 2)
    modf_rows = jnp.broadcast_to(modf[:, :, None, :], (2, b, s, D)).reshape(2, rows, D)

    # RoPE tables in the permuted lane layout, rotate_half sign folded into sin
    perm, sign = rope_permutation()
    cos_full, sin_full = rotary_tables_full(s)
    cos_rows = jnp.tile(cos_full[:, perm], (b, 1))                          # (B*S, D)
    sinsign_rows = jnp.tile(sin_full[:, perm] * sign[None, :], (b, 1))

    # per-head lane masks: permuted layout for q/k, original layout for v
    hm_qk = np.zeros((H, D), np.float32)
    hm_v = np.zeros((H, D), np.float32)
    for h in range(H):
        hm_v[h, h * DH:(h + 1) * DH] = 1.0
    for j in range(D):
        hm_qk[int(perm[j]) // DH, j] = 1.0

    # block-diagonal additive batch mask for the folded (B*S, B*S) scores
    rb = np.arange(rows) // s
    batch_mask = np.where(rb[:, None] == rb[None, :], 0.0, NEG_INF).astype(np.float32)

    wp = {**blocks, "lnf_w": final["lnf_w"],
          "lin_w": final["lin_w"], "lin_b": final["lin_b"]}
    out = run_dit_fused(x, mod_rows, modf_rows, cos_rows, sinsign_rows,
                        jnp.asarray(hm_qk), jnp.asarray(hm_v),
                        jnp.asarray(batch_mask), wp)
    return out.reshape(b, s, V_PAD)[:, :, :V]                               # strip lane padding


# ----------------------------- deterministic parameter init -----------------------------
def _rnd(key, shape, scale=0.05):
    return (jax.random.normal(key, shape, dtype=jnp.float32) * scale).astype(jnp.float32)


def init_params(key):
    keys = iter(jax.random.split(key, 64))
    p = {}
    p["vocab_embed"] = _rnd(next(keys), (V, D), 0.1)
    # TimestepEmbedder MLP
    p["t_w1"] = _rnd(next(keys), (FREQ_EMB, C))
    p["t_b1"] = _rnd(next(keys), (C,))
    p["t_w2"] = _rnd(next(keys), (C, C))
    p["t_b2"] = _rnd(next(keys), (C,))

    # DDiT blocks stacked on a leading axis; matmul weights stored in bf16.
    # The rotate_half pair permutation is folded into the Wq/Wk output columns at
    # init time (pure reparameterisation: the kernel's permuted-layout RoPE + head
    # masks are equivalent to the reference layout).
    # TODO(synk): PyTorch __init__ zero-initializes adaLN_modulation and the final
    # linear (which would make the whole forward output exactly zero); small
    # deterministic random values are used instead so the kernel path is exercised.
    perm, _ = rope_permutation()
    wqkv = _rnd(next(keys), (N_BLOCKS, 3, D, D))
    blocks = {
        "ln1_w": _rnd(next(keys), (N_BLOCKS, 1, D), 0.02) + 1.0,
        "wq": wqkv[:, 0][:, :, perm].astype(jnp.bfloat16),
        "wk": wqkv[:, 1][:, :, perm].astype(jnp.bfloat16),
        "wv": wqkv[:, 2].astype(jnp.bfloat16),
        "wo": _rnd(next(keys), (N_BLOCKS, D, D)).astype(jnp.bfloat16),
        "ln2_w": _rnd(next(keys), (N_BLOCKS, 1, D), 0.02) + 1.0,
        "w1": _rnd(next(keys), (N_BLOCKS, D, MLP_RATIO * D)).astype(jnp.bfloat16),
        "b1": _rnd(next(keys), (N_BLOCKS, 1, MLP_RATIO * D)),
        "w2": _rnd(next(keys), (N_BLOCKS, MLP_RATIO * D, D)).astype(jnp.bfloat16),
        "b2": _rnd(next(keys), (N_BLOCKS, 1, D)),
        "ada_w": _rnd(next(keys), (N_BLOCKS, C, 6 * D)),
        "ada_b": _rnd(next(keys), (N_BLOCKS, 1, 6 * D)),
    }
    p["blocks"] = blocks
    lin_w = _rnd(next(keys), (D, V))
    lin_b = _rnd(next(keys), (1, V))
    # pad logits dim to V_PAD for lane-dense stores; padded columns are zero
    lin_w = jnp.pad(lin_w, ((0, 0), (0, V_PAD - V))).astype(jnp.bfloat16)
    lin_b = jnp.pad(lin_b, ((0, 0), (0, V_PAD - V)))
    p["final"] = {
        "lnf_w": _rnd(next(keys), (1, D), 0.02) + 1.0,
        "ada_w": _rnd(next(keys), (C, 2 * D)),
        "ada_b": _rnd(next(keys), (1, 2 * D)),
        "lin_w": lin_w,
        "lin_b": lin_b,
    }
    return p


# ----------------------------- main -----------------------------
if __name__ == "__main__":
    key = jax.random.PRNGKey(0)
    k_par, k_idx, k_sig = jax.random.split(key, 3)
    params = init_params(k_par)
    indices = jax.random.randint(k_idx, (B, S), 0, V, dtype=jnp.int32)
    sigma = jax.random.uniform(k_sig, (B,), dtype=jnp.float32)

    out = dit_forward(indices, sigma, params)
    out = jax.block_until_ready(out)
    assert out.shape == (B, S, V), out.shape
    assert bool(jnp.all(jnp.isfinite(out)))
    print("KERNEL_OK")
</pallas_src>

<mosaic_0001>
module attributes {stable_mosaic.version = 11 : i64} {
  func.func @dit_fused_kernel(%arg0: memref<16x32xf32, #tpu.memory_space<vmem>>, %arg1: memref<2x6x16x32xf32, #tpu.memory_space<vmem>>, %arg2: memref<2x16x32xf32, #tpu.memory_space<vmem>>, %arg3: memref<16x32xf32, #tpu.memory_space<vmem>>, %arg4: memref<16x32xf32, #tpu.memory_space<vmem>>, %arg5: memref<2x32xf32, #tpu.memory_space<vmem>>, %arg6: memref<2x32xf32, #tpu.memory_space<vmem>>, %arg7: memref<16x16xf32, #tpu.memory_space<vmem>>, %arg8: memref<2x1x32xf32, #tpu.memory_space<vmem>>, %arg9: memref<2x32x32xbf16, #tpu.memory_space<vmem>>, %arg10: memref<2x32x32xbf16, #tpu.memory_space<vmem>>, %arg11: memref<2x32x32xbf16, #tpu.memory_space<vmem>>, %arg12: memref<2x32x32xbf16, #tpu.memory_space<vmem>>, %arg13: memref<2x1x32xf32, #tpu.memory_space<vmem>>, %arg14: memref<2x32x128xbf16, #tpu.memory_space<vmem>>, %arg15: memref<2x1x128xf32, #tpu.memory_space<vmem>>, %arg16: memref<2x128x32xbf16, #tpu.memory_space<vmem>>, %arg17: memref<2x1x32xf32, #tpu.memory_space<vmem>>, %arg18: memref<1x32xf32, #tpu.memory_space<vmem>>, %arg19: memref<32x128xbf16, #tpu.memory_space<vmem>>, %arg20: memref<1x128xf32, #tpu.memory_space<vmem>>, %arg21: memref<16x128xf32, #tpu.memory_space<vmem>>) attributes {dimension_semantics = [], scalar_prefetch = 0 : i64, scratch_operands = 0 : i64, tpu.core_type = #tpu.core_type<tc>} {
    %c0 = arith.constant 0 : index
    %c0_0 = arith.constant 0 : index
    %0 = vector.load %arg0[%c0, %c0_0] : memref<16x32xf32, #tpu.memory_space<vmem>>, vector<16x32xf32>
    %c0_1 = arith.constant 0 : index
    %c0_2 = arith.constant 0 : index
    %1 = vector.load %arg3[%c0_1, %c0_2] : memref<16x32xf32, #tpu.memory_space<vmem>>, vector<16x32xf32>
    %c0_3 = arith.constant 0 : index
    %c0_4 = arith.constant 0 : index
    %2 = vector.load %arg4[%c0_3, %c0_4] : memref<16x32xf32, #tpu.memory_space<vmem>>, vector<16x32xf32>
    %c0_5 = arith.constant 0 : index
    %c0_6 = arith.constant 0 : index
    %3 = vector.load %arg7[%c0_5, %c0_6] : memref<16x16xf32, #tpu.memory_space<vmem>>, vector<16x16xf32>
    %c0_7 = arith.constant 0 : index
    %c0_8 = arith.constant 0 : index
    %c0_9 = arith.constant 0 : index
    %c0_10 = arith.constant 0 : index
    %4 = vector.load %arg1[%c0_7, %c0_8, %c0_9, %c0_10] : memref<2x6x16x32xf32, #tpu.memory_space<vmem>>, vector<1x1x16x32xf32>
    %5 = vector.shape_cast %4 : vector<1x1x16x32xf32> to vector<16x32xf32>
    %c0_11 = arith.constant 0 : index
    %c1 = arith.constant 1 : index
    %c0_12 = arith.constant 0 : index
    %c0_13 = arith.constant 0 : index
    %6 = vector.load %arg1[%c0_11, %c1, %c0_12, %c0_13] : memref<2x6x16x32xf32, #tpu.memory_space<vmem>>, vector<1x1x16x32xf32>
    %7 = vector.shape_cast %6 : vector<1x1x16x32xf32> to vector<16x32xf32>
    %c0_14 = arith.constant 0 : index
    %c2 = arith.constant 2 : index
    %c0_15 = arith.constant 0 : index
    %c0_16 = arith.constant 0 : index
    %8 = vector.load %arg1[%c0_14, %c2, %c0_15, %c0_16] : memref<2x6x16x32xf32, #tpu.memory_space<vmem>>, vector<1x1x16x32xf32>
    %9 = vector.shape_cast %8 : vector<1x1x16x32xf32> to vector<16x32xf32>
    %c0_17 = arith.constant 0 : index
    %c3 = arith.constant 3 : index
    %c0_18 = arith.constant 0 : index
    %c0_19 = arith.constant 0 : index
    %10 = vector.load %arg1[%c0_17, %c3, %c0_18, %c0_19] : memref<2x6x16x32xf32, #tpu.memory_space<vmem>>, vector<1x1x16x32xf32>
    %11 = vector.shape_cast %10 : vector<1x1x16x32xf32> to vector<16x32xf32>
    %c0_20 = arith.constant 0 : index
    %c4 = arith.constant 4 : index
    %c0_21 = arith.constant 0 : index
    %c0_22 = arith.constant 0 : index
    %12 = vector.load %arg1[%c0_20, %c4, %c0_21, %c0_22] : memref<2x6x16x32xf32, #tpu.memory_space<vmem>>, vector<1x1x16x32xf32>
    %13 = vector.shape_cast %12 : vector<1x1x16x32xf32> to vector<16x32xf32>
    %c0_23 = arith.constant 0 : index
    %c5 = arith.constant 5 : index
    %c0_24 = arith.constant 0 : index
    %c0_25 = arith.constant 0 : index
    %14 = vector.load %arg1[%c0_23, %c5, %c0_24, %c0_25] : memref<2x6x16x32xf32, #tpu.memory_space<vmem>>, vector<1x1x16x32xf32>
    %15 = vector.shape_cast %14 : vector<1x1x16x32xf32> to vector<16x32xf32>
    %c0_26 = arith.constant 0 : index
    %c0_27 = arith.constant 0 : index
    %c0_28 = arith.constant 0 : index
    %16 = vector.load %arg8[%c0_26, %c0_27, %c0_28] : memref<2x1x32xf32, #tpu.memory_space<vmem>>, vector<1x1x32xf32>
    %17 = vector.shape_cast %16 : vector<1x1x32xf32> to vector<1x32xf32>
    %cst = arith.constant dense<0.000000e+00> : vector<16xf32>
    %18 = vector.multi_reduction <add>, %0, %cst [1] : vector<16x32xf32> to vector<16xf32>
    %19 = vector.shape_cast %18 : vector<16xf32> to vector<16x1xf32>
    %cst_29 = arith.constant 3.200000e+01 : f32
    %20 = vector.broadcast %cst_29 : f32 to vector<16x1xf32>
    %21 = arith.divf %19, %20 : vector<16x1xf32>
    %22 = vector.broadcast %21 : vector<16x1xf32> to vector<16x32xf32>
    %23 = arith.subf %0, %22 : vector<16x32xf32>
    %24 = arith.mulf %23, %23 : vector<16x32xf32>
    %cst_30 = arith.constant dense<0.000000e+00> : vector<16xf32>
    %25 = vector.multi_reduction <add>, %24, %cst_30 [1] : vector<16x32xf32> to vector<16xf32>
    %26 = vector.shape_cast %25 : vector<16xf32> to vector<16x1xf32>
    %cst_31 = arith.constant 3.200000e+01 : f32
    %27 = vector.broadcast %cst_31 : f32 to vector<16x1xf32>
    %28 = arith.divf %26, %27 : vector<16x1xf32>
    %29 = vector.broadcast %21 : vector<16x1xf32> to vector<16x32xf32>
    %30 = arith.subf %0, %29 : vector<16x32xf32>
    %cst_32 = arith.constant 9.99999974E-6 : f32
    %31 = vector.broadcast %cst_32 : f32 to vector<16x1xf32>
    %32 = arith.addf %28, %31 : vector<16x1xf32>
    %33 = math.rsqrt %32 : vector<16x1xf32>
    %34 = vector.broadcast %33 : vector<16x1xf32> to vector<16x32xf32>
    %35 = arith.mulf %30, %34 : vector<16x32xf32>
    %36 = vector.broadcast %17 : vector<1x32xf32> to vector<16x32xf32>
    %37 = arith.mulf %35, %36 : vector<16x32xf32>
    %cst_33 = arith.constant 1.000000e+00 : f32
    %38 = vector.broadcast %cst_33 : f32 to vector<16x32xf32>
    %39 = arith.addf %38, %7 : vector<16x32xf32>
    %40 = arith.mulf %37, %39 : vector<16x32xf32>
    %41 = arith.addf %40, %5 : vector<16x32xf32>
    %42 = arith.truncf %41 : vector<16x32xf32> to vector<16x32xbf16>
    %c0_34 = arith.constant 0 : index
    %c0_35 = arith.constant 0 : index
    %c0_36 = arith.constant 0 : index
    %43 = vector.load %arg9[%c0_34, %c0_35, %c0_36] : memref<2x32x32xbf16, #tpu.memory_space<vmem>>, vector<1x32x32xbf16>
    %44 = vector.shape_cast %43 : vector<1x32x32xbf16> to vector<32x32xbf16>
    %cst_37 = arith.constant dense<0.000000e+00> : vector<16x32xf32>
    %45 = tpu.matmul %42, %44, %cst_37 {dimension_numbers = #tpu.dot_dimension_numbers<[1], [0], [0], [1], [0, 0, 1, 1], [], []>} : vector<16x32xbf16>, vector<32x32xbf16>, vector<16x32xf32> -> vector<16x32xf32>
    %c0_38 = arith.constant 0 : index
    %c0_39 = arith.constant 0 : index
    %c0_40 = arith.constant 0 : index
    %46 = vector.load %arg10[%c0_38, %c0_39, %c0_40] : memref<2x32x32xbf16, #tpu.memory_space<vmem>>, vector<1x32x32xbf16>
    %47 = vector.shape_cast %46 : vector<1x32x32xbf16> to vector<32x32xbf16>
    %cst_41 = arith.constant dense<0.000000e+00> : vector<16x32xf32>
    %48 = tpu.matmul %42, %47, %cst_41 {dimension_numbers = #tpu.dot_dimension_numbers<[1], [0], [0], [1], [0, 0, 1, 1], [], []>} : vector<16x32xbf16>, vector<32x32xbf16>, vector<16x32xf32> -> vector<16x32xf32>
    %c0_42 = arith.constant 0 : index
    %c0_43 = arith.constant 0 : index
    %c0_44 = arith.constant 0 : index
    %49 = vector.load %arg11[%c0_42, %c0_43, %c0_44] : memref<2x32x32xbf16, #tpu.memory_space<vmem>>, vector<1x32x32xbf16>
    %50 = vector.shape_cast %49 : vector<1x32x32xbf16> to vector<32x32xbf16>
    %cst_45 = arith.constant dense<0.000000e+00> : vector<16x32xf32>
    %51 = tpu.matmul %42, %50, %cst_45 {dimension_numbers = #tpu.dot_dimension_numbers<[1], [0], [0], [1], [0, 0, 1, 1], [], []>} : vector<16x32xbf16>, vector<32x32xbf16>, vector<16x32xf32> -> vector<16x32xf32>
    %52 = arith.mulf %45, %1 : vector<16x32xf32>
    %c16_i32 = arith.constant 16 : i32
    %53 = tpu.dynamic_rotate %45 by %c16_i32 dim 1 : vector<16x32xf32>, i32 -> vector<16x32xf32>
    %54 = arith.mulf %53, %2 : vector<16x32xf32>
    %55 = arith.addf %52, %54 : vector<16x32xf32>
    %56 = arith.mulf %48, %1 : vector<16x32xf32>
    %c16_i32_46 = arith.constant 16 : i32
    %57 = tpu.dynamic_rotate %48 by %c16_i32_46 dim 1 : vector<16x32xf32>, i32 -> vector<16x32xf32>
    %58 = arith.mulf %57, %2 : vector<16x32xf32>
    %59 = arith.addf %56, %58 : vector<16x32xf32>
    %cst_47 = arith.constant 0.000000e+00 : f32
    %60 = vector.broadcast %cst_47 : f32 to vector<16x32xf32>
    %c0_48 = arith.constant 0 : index
    %c0_49 = arith.constant 0 : index
    %61 = vector.load %arg5[%c0_48, %c0_49] : memref<2x32xf32, #tpu.memory_space<vmem>>, vector<1x32xf32>
    %62 = vector.broadcast %61 : vector<1x32xf32> to vector<16x32xf32>
    %63 = arith.mulf %55, %62 : vector<16x32xf32>
    %cst_50 = arith.constant 2.500000e-01 : f32
    %64 = vector.broadcast %cst_50 : f32 to vector<16x32xf32>
    %65 = arith.mulf %63, %64 : vector<16x32xf32>
    %cst_51 = arith.constant dense<0.000000e+00> : vector<16x16xf32>
    %66 = tpu.matmul %65, %59, %cst_51 {dimension_numbers = #tpu.dot_dimension_numbers<[1], [1], [0], [0], [0, 0, 1, 0], [], []>} : vector<16x32xf32>, vector<16x32xf32>, vector<16x16xf32> -> vector<16x16xf32>
    %67 = arith.addf %66, %3 : vector<16x16xf32>
    %cst_52 = arith.constant dense<0xFF800000> : vector<16xf32>
    %68 = vector.multi_reduction <maximumf>, %67, %cst_52 [1] : vector<16x16xf32> to vector<16xf32>
    %69 = vector.shape_cast %68 : vector<16xf32> to vector<16x1xf32>
    %70 = vector.broadcast %69 : vector<16x1xf32> to vector<16x16xf32>
    %71 = arith.subf %67, %70 : vector<16x16xf32>
    %72 = math.exp %71 : vector<16x16xf32>
    %cst_53 = arith.constant dense<0.000000e+00> : vector<16xf32>
    %73 = vector.multi_reduction <add>, %72, %cst_53 [1] : vector<16x16xf32> to vector<16xf32>
    %74 = vector.shape_cast %73 : vector<16xf32> to vector<16x1xf32>
    %75 = vector.broadcast %74 : vector<16x1xf32> to vector<16x16xf32>
    %76 = arith.divf %72, %75 : vector<16x16xf32>
    %c0_54 = arith.constant 0 : index
    %c0_55 = arith.constant 0 : index
    %77 = vector.load %arg6[%c0_54, %c0_55] : memref<2x32xf32, #tpu.memory_space<vmem>>, vector<1x32xf32>
    %78 = vector.broadcast %77 : vector<1x32xf32> to vector<16x32xf32>
    %79 = arith.mulf %51, %78 : vector<16x32xf32>
    %cst_56 = arith.constant dense<0.000000e+00> : vector<16x32xf32>
    %80 = tpu.matmul %76, %79, %cst_56 {dimension_numbers = #tpu.dot_dimension_numbers<[1], [0], [0], [1], [0, 0, 1, 1], [], []>} : vector<16x16xf32>, vector<16x32xf32>, vector<16x32xf32> -> vector<16x32xf32>
    %81 = arith.addf %60, %80 : vector<16x32xf32>
    %c1_57 = arith.constant 1 : index
    %c0_58 = arith.constant 0 : index
    %82 = vector.load %arg5[%c1_57, %c0_58] : memref<2x32xf32, #tpu.memory_space<vmem>>, vector<1x32xf32>
    %83 = vector.broadcast %82 : vector<1x32xf32> to vector<16x32xf32>
    %84 = arith.mulf %55, %83 : vector<16x32xf32>
    %cst_59 = arith.constant 2.500000e-01 : f32
    %85 = vector.broadcast %cst_59 : f32 to vector<16x32xf32>
    %86 = arith.mulf %84, %85 : vector<16x32xf32>
    %cst_60 = arith.constant dense<0.000000e+00> : vector<16x16xf32>
    %87 = tpu.matmul %86, %59, %cst_60 {dimension_numbers = #tpu.dot_dimension_numbers<[1], [1], [0], [0], [0, 0, 1, 0], [], []>} : vector<16x32xf32>, vector<16x32xf32>, vector<16x16xf32> -> vector<16x16xf32>
    %88 = arith.addf %87, %3 : vector<16x16xf32>
    %cst_61 = arith.constant dense<0xFF800000> : vector<16xf32>
    %89 = vector.multi_reduction <maximumf>, %88, %cst_61 [1] : vector<16x16xf32> to vector<16xf32>
    %90 = vector.shape_cast %89 : vector<16xf32> to vector<16x1xf32>
    %91 = vector.broadcast %90 : vector<16x1xf32> to vector<16x16xf32>
    %92 = arith.subf %88, %91 : vector<16x16xf32>
    %93 = math.exp %92 : vector<16x16xf32>
    %cst_62 = arith.constant dense<0.000000e+00> : vector<16xf32>
    %94 = vector.multi_reduction <add>, %93, %cst_62 [1] : vector<16x16xf32> to vector<16xf32>
    %95 = vector.shape_cast %94 : vector<16xf32> to vector<16x1xf32>
    %96 = vector.broadcast %95 : vector<16x1xf32> to vector<16x16xf32>
    %97 = arith.divf %93, %96 : vector<16x16xf32>
    %c1_63 = arith.constant 1 : index
    %c0_64 = arith.constant 0 : index
    %98 = vector.load %arg6[%c1_63, %c0_64] : memref<2x32xf32, #tpu.memory_space<vmem>>, vector<1x32xf32>
    %99 = vector.broadcast %98 : vector<1x32xf32> to vector<16x32xf32>
    %100 = arith.mulf %51, %99 : vector<16x32xf32>
    %cst_65 = arith.constant dense<0.000000e+00> : vector<16x32xf32>
    %101 = tpu.matmul %97, %100, %cst_65 {dimension_numbers = #tpu.dot_dimension_numbers<[1], [0], [0], [1], [0, 0, 1, 1], [], []>} : vector<16x16xf32>, vector<16x32xf32>, vector<16x32xf32> -> vector<16x32xf32>
    %102 = arith.addf %81, %101 : vector<16x32xf32>
    %103 = arith.truncf %102 : vector<16x32xf32> to vector<16x32xbf16>
    %c0_66 = arith.constant 0 : index
    %c0_67 = arith.constant 0 : index
    %c0_68 = arith.constant 0 : index
    %104 = vector.load %arg12[%c0_66, %c0_67, %c0_68] : memref<2x32x32xbf16, #tpu.memory_space<vmem>>, vector<1x32x32xbf16>
    %105 = vector.shape_cast %104 : vector<1x32x32xbf16> to vector<32x32xbf16>
    %cst_69 = arith.constant dense<0.000000e+00> : vector<16x32xf32>
    %106 = tpu.matmul %103, %105, %cst_69 {dimension_numbers = #tpu.dot_dimension_numbers<[1], [0], [0], [1], [0, 0, 1, 1], [], []>} : vector<16x32xbf16>, vector<32x32xbf16>, vector<16x32xf32> -> vector<16x32xf32>
    %107 = arith.mulf %9, %106 : vector<16x32xf32>
    %108 = arith.addf %0, %107 : vector<16x32xf32>
    %c0_70 = arith.constant 0 : index
    %c0_71 = arith.constant 0 : index
    %c0_72 = arith.constant 0 : index
    %109 = vector.load %arg13[%c0_70, %c0_71, %c0_72] : memref<2x1x32xf32, #tpu.memory_space<vmem>>, vector<1x1x32xf32>
    %110 = vector.shape_cast %109 : vector<1x1x32xf32> to vector<1x32xf32>
    %cst_73 = arith.constant dense<0.000000e+00> : vector<16xf32>
    %111 = vector.multi_reduction <add>, %108, %cst_73 [1] : vector<16x32xf32> to vector<16xf32>
    %112 = vector.shape_cast %111 : vector<16xf32> to vector<16x1xf32>
    %cst_74 = arith.constant 3.200000e+01 : f32
    %113 = vector.broadcast %cst_74 : f32 to vector<16x1xf32>
    %114 = arith.divf %112, %113 : vector<16x1xf32>
    %115 = vector.broadcast %114 : vector<16x1xf32> to vector<16x32xf32>
    %116 = arith.subf %108, %115 : vector<16x32xf32>
    %117 = arith.mulf %116, %116 : vector<16x32xf32>
    %cst_75 = arith.constant dense<0.000000e+00> : vector<16xf32>
    %118 = vector.multi_reduction <add>, %117, %cst_75 [1] : vector<16x32xf32> to vector<16xf32>
    %119 = vector.shape_cast %118 : vector<16xf32> to vector<16x1xf32>
    %cst_76 = arith.constant 3.200000e+01 : f32
    %120 = vector.broadcast %cst_76 : f32 to vector<16x1xf32>
    %121 = arith.divf %119, %120 : vector<16x1xf32>
    %122 = vector.broadcast %114 : vector<16x1xf32> to vector<16x32xf32>
    %123 = arith.subf %108, %122 : vector<16x32xf32>
    %cst_77 = arith.constant 9.99999974E-6 : f32
    %124 = vector.broadcast %cst_77 : f32 to vector<16x1xf32>
    %125 = arith.addf %121, %124 : vector<16x1xf32>
    %126 = math.rsqrt %125 : vector<16x1xf32>
    %127 = vector.broadcast %126 : vector<16x1xf32> to vector<16x32xf32>
    %128 = arith.mulf %123, %127 : vector<16x32xf32>
    %129 = vector.broadcast %110 : vector<1x32xf32> to vector<16x32xf32>
    %130 = arith.mulf %128, %129 : vector<16x32xf32>
    %cst_78 = arith.constant 1.000000e+00 : f32
    %131 = vector.broadcast %cst_78 : f32 to vector<16x32xf32>
    %132 = arith.addf %131, %13 : vector<16x32xf32>
    %133 = arith.mulf %130, %132 : vector<16x32xf32>
    %134 = arith.addf %133, %11 : vector<16x32xf32>
    %135 = arith.truncf %134 : vector<16x32xf32> to vector<16x32xbf16>
    %c0_79 = arith.constant 0 : index
    %c0_80 = arith.constant 0 : index
    %c0_81 = arith.constant 0 : index
    %136 = vector.load %arg14[%c0_79, %c0_80, %c0_81] : memref<2x32x128xbf16, #tpu.memory_space<vmem>>, vector<1x32x128xbf16>
    %137 = vector.shape_cast %136 : vector<1x32x128xbf16> to vector<32x128xbf16>
    %cst_82 = arith.constant dense<0.000000e+00> : vector<16x128xf32>
    %138 = tpu.matmul %135, %137, %cst_82 {dimension_numbers = #tpu.dot_dimension_numbers<[1], [0], [0], [1], [0, 0, 1, 1], [], []>} : vector<16x32xbf16>, vector<32x128xbf16>, vector<16x128xf32> -> vector<16x128xf32>
    %c0_83 = arith.constant 0 : index
    %c0_84 = arith.constant 0 : index
    %c0_85 = arith.constant 0 : index
    %139 = vector.load %arg15[%c0_83, %c0_84, %c0_85] : memref<2x1x128xf32, #tpu.memory_space<vmem>>, vector<1x1x128xf32>
    %140 = vector.shape_cast %139 : vector<1x1x128xf32> to vector<1x128xf32>
    %141 = vector.broadcast %140 : vector<1x128xf32> to vector<16x128xf32>
    %142 = arith.addf %138, %141 : vector<16x128xf32>
    %cst_86 = arith.constant 5.000000e-01 : f32
    %143 = vector.broadcast %cst_86 : f32 to vector<16x128xf32>
    %144 = arith.mulf %143, %142 : vector<16x128xf32>
    %cst_87 = arith.constant 4.471500e-02 : f32
    %145 = vector.broadcast %cst_87 : f32 to vector<16x128xf32>
    %146 = arith.mulf %145, %142 : vector<16x128xf32>
    %147 = arith.mulf %146, %142 : vector<16x128xf32>
    %148 = arith.mulf %147, %142 : vector<16x128xf32>
    %149 = arith.addf %142, %148 : vector<16x128xf32>
    %cst_88 = arith.constant 0.797884583 : f32
    %150 = vector.broadcast %cst_88 : f32 to vector<16x128xf32>
    %151 = arith.mulf %150, %149 : vector<16x128xf32>
    %152 = math.tanh %151 : vector<16x128xf32>
    %cst_89 = arith.constant 1.000000e+00 : f32
    %153 = vector.broadcast %cst_89 : f32 to vector<16x128xf32>
    %154 = arith.addf %153, %152 : vector<16x128xf32>
    %155 = arith.mulf %144, %154 : vector<16x128xf32>
    %156 = arith.truncf %155 : vector<16x128xf32> to vector<16x128xbf16>
    %c0_90 = arith.constant 0 : index
    %c0_91 = arith.constant 0 : index
    %c0_92 = arith.constant 0 : index
    %157 = vector.load %arg16[%c0_90, %c0_91, %c0_92] : memref<2x128x32xbf16, #tpu.memory_space<vmem>>, vector<1x128x32xbf16>
    %158 = vector.shape_cast %157 : vector<1x128x32xbf16> to vector<128x32xbf16>
    %cst_93 = arith.constant dense<0.000000e+00> : vector<16x32xf32>
    %159 = tpu.matmul %156, %158, %cst_93 {dimension_numbers = #tpu.dot_dimension_numbers<[1], [0], [0], [1], [0, 0, 1, 1], [], []>} : vector<16x128xbf16>, vector<128x32xbf16>, vector<16x32xf32> -> vector<16x32xf32>
    %c0_94 = arith.constant 0 : index
    %c0_95 = arith.constant 0 : index
    %c0_96 = arith.constant 0 : index
    %160 = vector.load %arg17[%c0_94, %c0_95, %c0_96] : memref<2x1x32xf32, #tpu.memory_space<vmem>>, vector<1x1x32xf32>
    %161 = vector.shape_cast %160 : vector<1x1x32xf32> to vector<1x32xf32>
    %162 = vector.broadcast %161 : vector<1x32xf32> to vector<16x32xf32>
    %163 = arith.addf %159, %162 : vector<16x32xf32>
    %164 = arith.mulf %15, %163 : vector<16x32xf32>
    %165 = arith.addf %108, %164 : vector<16x32xf32>
    %c1_97 = arith.constant 1 : index
    %c0_98 = arith.constant 0 : index
    %c0_99 = arith.constant 0 : index
    %c0_100 = arith.constant 0 : index
    %166 = vector.load %arg1[%c1_97, %c0_98, %c0_99, %c0_100] : memref<2x6x16x32xf32, #tpu.memory_space<vmem>>, vector<1x1x16x32xf32>
    %167 = vector.shape_cast %166 : vector<1x1x16x32xf32> to vector<16x32xf32>
    %c1_101 = arith.constant 1 : index
    %c1_102 = arith.constant 1 : index
    %c0_103 = arith.constant 0 : index
    %c0_104 = arith.constant 0 : index
    %168 = vector.load %arg1[%c1_101, %c1_102, %c0_103, %c0_104] : memref<2x6x16x32xf32, #tpu.memory_space<vmem>>, vector<1x1x16x32xf32>
    %169 = vector.shape_cast %168 : vector<1x1x16x32xf32> to vector<16x32xf32>
    %c1_105 = arith.constant 1 : index
    %c2_106 = arith.constant 2 : index
    %c0_107 = arith.constant 0 : index
    %c0_108 = arith.constant 0 : index
    %170 = vector.load %arg1[%c1_105, %c2_106, %c0_107, %c0_108] : memref<2x6x16x32xf32, #tpu.memory_space<vmem>>, vector<1x1x16x32xf32>
    %171 = vector.shape_cast %170 : vector<1x1x16x32xf32> to vector<16x32xf32>
    %c1_109 = arith.constant 1 : index
    %c3_110 = arith.constant 3 : index
    %c0_111 = arith.constant 0 : index
    %c0_112 = arith.constant 0 : index
    %172 = vector.load %arg1[%c1_109, %c3_110, %c0_111, %c0_112] : memref<2x6x16x32xf32, #tpu.memory_space<vmem>>, vector<1x1x16x32xf32>
    %173 = vector.shape_cast %172 : vector<1x1x16x32xf32> to vector<16x32xf32>
    %c1_113 = arith.constant 1 : index
    %c4_114 = arith.constant 4 : index
    %c0_115 = arith.constant 0 : index
    %c0_116 = arith.constant 0 : index
    %174 = vector.load %arg1[%c1_113, %c4_114, %c0_115, %c0_116] : memref<2x6x16x32xf32, #tpu.memory_space<vmem>>, vector<1x1x16x32xf32>
    %175 = vector.shape_cast %174 : vector<1x1x16x32xf32> to vector<16x32xf32>
    %c1_117 = arith.constant 1 : index
    %c5_118 = arith.constant 5 : index
    %c0_119 = arith.constant 0 : index
    %c0_120 = arith.constant 0 : index
    %176 = vector.load %arg1[%c1_117, %c5_118, %c0_119, %c0_120] : memref<2x6x16x32xf32, #tpu.memory_space<vmem>>, vector<1x1x16x32xf32>
    %177 = vector.shape_cast %176 : vector<1x1x16x32xf32> to vector<16x32xf32>
    %c1_121 = arith.constant 1 : index
    %c0_122 = arith.constant 0 : index
    %c0_123 = arith.constant 0 : index
    %178 = vector.load %arg8[%c1_121, %c0_122, %c0_123] : memref<2x1x32xf32, #tpu.memory_space<vmem>>, vector<1x1x32xf32>
    %179 = vector.shape_cast %178 : vector<1x1x32xf32> to vector<1x32xf32>
    %cst_124 = arith.constant dense<0.000000e+00> : vector<16xf32>
    %180 = vector.multi_reduction <add>, %165, %cst_124 [1] : vector<16x32xf32> to vector<16xf32>
    %181 = vector.shape_cast %180 : vector<16xf32> to vector<16x1xf32>
    %cst_125 = arith.constant 3.200000e+01 : f32
    %182 = vector.broadcast %cst_125 : f32 to vector<16x1xf32>
    %183 = arith.divf %181, %182 : vector<16x1xf32>
    %184 = vector.broadcast %183 : vector<16x1xf32> to vector<16x32xf32>
    %185 = arith.subf %165, %184 : vector<16x32xf32>
    %186 = arith.mulf %185, %185 : vector<16x32xf32>
    %cst_126 = arith.constant dense<0.000000e+00> : vector<16xf32>
    %187 = vector.multi_reduction <add>, %186, %cst_126 [1] : vector<16x32xf32> to vector<16xf32>
    %188 = vector.shape_cast %187 : vector<16xf32> to vector<16x1xf32>
    %cst_127 = arith.constant 3.200000e+01 : f32
    %189 = vector.broadcast %cst_127 : f32 to vector<16x1xf32>
    %190 = arith.divf %188, %189 : vector<16x1xf32>
    %191 = vector.broadcast %183 : vector<16x1xf32> to vector<16x32xf32>
    %192 = arith.subf %165, %191 : vector<16x32xf32>
    %cst_128 = arith.constant 9.99999974E-6 : f32
    %193 = vector.broadcast %cst_128 : f32 to vector<16x1xf32>
    %194 = arith.addf %190, %193 : vector<16x1xf32>
    %195 = math.rsqrt %194 : vector<16x1xf32>
    %196 = vector.broadcast %195 : vector<16x1xf32> to vector<16x32xf32>
    %197 = arith.mulf %192, %196 : vector<16x32xf32>
    %198 = vector.broadcast %179 : vector<1x32xf32> to vector<16x32xf32>
    %199 = arith.mulf %197, %198 : vector<16x32xf32>
    %cst_129 = arith.constant 1.000000e+00 : f32
    %200 = vector.broadcast %cst_129 : f32 to vector<16x32xf32>
    %201 = arith.addf %200, %169 : vector<16x32xf32>
    %202 = arith.mulf %199, %201 : vector<16x32xf32>
    %203 = arith.addf %202, %167 : vector<16x32xf32>
    %204 = arith.truncf %203 : vector<16x32xf32> to vector<16x32xbf16>
    %c1_130 = arith.constant 1 : index
    %c0_131 = arith.constant 0 : index
    %c0_132 = arith.constant 0 : index
    %205 = vector.load %arg9[%c1_130, %c0_131, %c0_132] : memref<2x32x32xbf16, #tpu.memory_space<vmem>>, vector<1x32x32xbf16>
    %206 = vector.shape_cast %205 : vector<1x32x32xbf16> to vector<32x32xbf16>
    %cst_133 = arith.constant dense<0.000000e+00> : vector<16x32xf32>
    %207 = tpu.matmul %204, %206, %cst_133 {dimension_numbers = #tpu.dot_dimension_numbers<[1], [0], [0], [1], [0, 0, 1, 1], [], []>} : vector<16x32xbf16>, vector<32x32xbf16>, vector<16x32xf32> -> vector<16x32xf32>
    %c1_134 = arith.constant 1 : index
    %c0_135 = arith.constant 0 : index
    %c0_136 = arith.constant 0 : index
    %208 = vector.load %arg10[%c1_134, %c0_135, %c0_136] : memref<2x32x32xbf16, #tpu.memory_space<vmem>>, vector<1x32x32xbf16>
    %209 = vector.shape_cast %208 : vector<1x32x32xbf16> to vector<32x32xbf16>
    %cst_137 = arith.constant dense<0.000000e+00> : vector<16x32xf32>
    %210 = tpu.matmul %204, %209, %cst_137 {dimension_numbers = #tpu.dot_dimension_numbers<[1], [0], [0], [1], [0, 0, 1, 1], [], []>} : vector<16x32xbf16>, vector<32x32xbf16>, vector<16x32xf32> -> vector<16x32xf32>
    %c1_138 = arith.constant 1 : index
    %c0_139 = arith.constant 0 : index
    %c0_140 = arith.constant 0 : index
    %211 = vector.load %arg11[%c1_138, %c0_139, %c0_140] : memref<2x32x32xbf16, #tpu.memory_space<vmem>>, vector<1x32x32xbf16>
    %212 = vector.shape_cast %211 : vector<1x32x32xbf16> to vector<32x32xbf16>
    %cst_141 = arith.constant dense<0.000000e+00> : vector<16x32xf32>
    %213 = tpu.matmul %204, %212, %cst_141 {dimension_numbers = #tpu.dot_dimension_numbers<[1], [0], [0], [1], [0, 0, 1, 1], [], []>} : vector<16x32xbf16>, vector<32x32xbf16>, vector<16x32xf32> -> vector<16x32xf32>
    %214 = arith.mulf %207, %1 : vector<16x32xf32>
    %c16_i32_142 = arith.constant 16 : i32
    %215 = tpu.dynamic_rotate %207 by %c16_i32_142 dim 1 : vector<16x32xf32>, i32 -> vector<16x32xf32>
    %216 = arith.mulf %215, %2 : vector<16x32xf32>
    %217 = arith.addf %214, %216 : vector<16x32xf32>
    %218 = arith.mulf %210, %1 : vector<16x32xf32>
    %c16_i32_143 = arith.constant 16 : i32
    %219 = tpu.dynamic_rotate %210 by %c16_i32_143 dim 1 : vector<16x32xf32>, i32 -> vector<16x32xf32>
    %220 = arith.mulf %219, %2 : vector<16x32xf32>
    %221 = arith.addf %218, %220 : vector<16x32xf32>
    %cst_144 = arith.constant 0.000000e+00 : f32
    %222 = vector.broadcast %cst_144 : f32 to vector<16x32xf32>
    %c0_145 = arith.constant 0 : index
    %c0_146 = arith.constant 0 : index
    %223 = vector.load %arg5[%c0_145, %c0_146] : memref<2x32xf32, #tpu.memory_space<vmem>>, vector<1x32xf32>
    %224 = vector.broadcast %223 : vector<1x32xf32> to vector<16x32xf32>
    %225 = arith.mulf %217, %224 : vector<16x32xf32>
    %cst_147 = arith.constant 2.500000e-01 : f32
    %226 = vector.broadcast %cst_147 : f32 to vector<16x32xf32>
    %227 = arith.mulf %225, %226 : vector<16x32xf32>
    %cst_148 = arith.constant dense<0.000000e+00> : vector<16x16xf32>
    %228 = tpu.matmul %227, %221, %cst_148 {dimension_numbers = #tpu.dot_dimension_numbers<[1], [1], [0], [0], [0, 0, 1, 0], [], []>} : vector<16x32xf32>, vector<16x32xf32>, vector<16x16xf32> -> vector<16x16xf32>
    %229 = arith.addf %228, %3 : vector<16x16xf32>
    %cst_149 = arith.constant dense<0xFF800000> : vector<16xf32>
    %230 = vector.multi_reduction <maximumf>, %229, %cst_149 [1] : vector<16x16xf32> to vector<16xf32>
    %231 = vector.shape_cast %230 : vector<16xf32> to vector<16x1xf32>
    %232 = vector.broadcast %231 : vector<16x1xf32> to vector<16x16xf32>
    %233 = arith.subf %229, %232 : vector<16x16xf32>
    %234 = math.exp %233 : vector<16x16xf32>
    %cst_150 = arith.constant dense<0.000000e+00> : vector<16xf32>
    %235 = vector.multi_reduction <add>, %234, %cst_150 [1] : vector<16x16xf32> to vector<16xf32>
    %236 = vector.shape_cast %235 : vector<16xf32> to vector<16x1xf32>
    %237 = vector.broadcast %236 : vector<16x1xf32> to vector<16x16xf32>
    %238 = arith.divf %234, %237 : vector<16x16xf32>
    %c0_151 = arith.constant 0 : index
    %c0_152 = arith.constant 0 : index
    %239 = vector.load %arg6[%c0_151, %c0_152] : memref<2x32xf32, #tpu.memory_space<vmem>>, vector<1x32xf32>
    %240 = vector.broadcast %239 : vector<1x32xf32> to vector<16x32xf32>
    %241 = arith.mulf %213, %240 : vector<16x32xf32>
    %cst_153 = arith.constant dense<0.000000e+00> : vector<16x32xf32>
    %242 = tpu.matmul %238, %241, %cst_153 {dimension_numbers = #tpu.dot_dimension_numbers<[1], [0], [0], [1], [0, 0, 1, 1], [], []>} : vector<16x16xf32>, vector<16x32xf32>, vector<16x32xf32> -> vector<16x32xf32>
    %243 = arith.addf %222, %242 : vector<16x32xf32>
    %c1_154 = arith.constant 1 : index
    %c0_155 = arith.constant 0 : index
    %244 = vector.load %arg5[%c1_154, %c0_155] : memref<2x32xf32, #tpu.memory_space<vmem>>, vector<1x32xf32>
    %245 = vector.broadcast %244 : vector<1x32xf32> to vector<16x32xf32>
    %246 = arith.mulf %217, %245 : vector<16x32xf32>
    %cst_156 = arith.constant 2.500000e-01 : f32
    %247 = vector.broadcast %cst_156 : f32 to vector<16x32xf32>
    %248 = arith.mulf %246, %247 : vector<16x32xf32>
    %cst_157 = arith.constant dense<0.000000e+00> : vector<16x16xf32>
    %249 = tpu.matmul %248, %221, %cst_157 {dimension_numbers = #tpu.dot_dimension_numbers<[1], [1], [0], [0], [0, 0, 1, 0], [], []>} : vector<16x32xf32>, vector<16x32xf32>, vector<16x16xf32> -> vector<16x16xf32>
    %250 = arith.addf %249, %3 : vector<16x16xf32>
    %cst_158 = arith.constant dense<0xFF800000> : vector<16xf32>
    %251 = vector.multi_reduction <maximumf>, %250, %cst_158 [1] : vector<16x16xf32> to vector<16xf32>
    %252 = vector.shape_cast %251 : vector<16xf32> to vector<16x1xf32>
    %253 = vector.broadcast %252 : vector<16x1xf32> to vector<16x16xf32>
    %254 = arith.subf %250, %253 : vector<16x16xf32>
    %255 = math.exp %254 : vector<16x16xf32>
    %cst_159 = arith.constant dense<0.000000e+00> : vector<16xf32>
    %256 = vector.multi_reduction <add>, %255, %cst_159 [1] : vector<16x16xf32> to vector<16xf32>
    %257 = vector.shape_cast %256 : vector<16xf32> to vector<16x1xf32>
    %258 = vector.broadcast %257 : vector<16x1xf32> to vector<16x16xf32>
    %259 = arith.divf %255, %258 : vector<16x16xf32>
    %c1_160 = arith.constant 1 : index
    %c0_161 = arith.constant 0 : index
    %260 = vector.load %arg6[%c1_160, %c0_161] : memref<2x32xf32, #tpu.memory_space<vmem>>, vector<1x32xf32>
    %261 = vector.broadcast %260 : vector<1x32xf32> to vector<16x32xf32>
    %262 = arith.mulf %213, %261 : vector<16x32xf32>
    %cst_162 = arith.constant dense<0.000000e+00> : vector<16x32xf32>
    %263 = tpu.matmul %259, %262, %cst_162 {dimension_numbers = #tpu.dot_dimension_numbers<[1], [0], [0], [1], [0, 0, 1, 1], [], []>} : vector<16x16xf32>, vector<16x32xf32>, vector<16x32xf32> -> vector<16x32xf32>
    %264 = arith.addf %243, %263 : vector<16x32xf32>
    %265 = arith.truncf %264 : vector<16x32xf32> to vector<16x32xbf16>
    %c1_163 = arith.constant 1 : index
    %c0_164 = arith.constant 0 : index
    %c0_165 = arith.constant 0 : index
    %266 = vector.load %arg12[%c1_163, %c0_164, %c0_165] : memref<2x32x32xbf16, #tpu.memory_space<vmem>>, vector<1x32x32xbf16>
    %267 = vector.shape_cast %266 : vector<1x32x32xbf16> to vector<32x32xbf16>
    %cst_166 = arith.constant dense<0.000000e+00> : vector<16x32xf32>
    %268 = tpu.matmul %265, %267, %cst_166 {dimension_numbers = #tpu.dot_dimension_numbers<[1], [0], [0], [1], [0, 0, 1, 1], [], []>} : vector<16x32xbf16>, vector<32x32xbf16>, vector<16x32xf32> -> vector<16x32xf32>
    %269 = arith.mulf %171, %268 : vector<16x32xf32>
    %270 = arith.addf %165, %269 : vector<16x32xf32>
    %c1_167 = arith.constant 1 : index
    %c0_168 = arith.constant 0 : index
    %c0_169 = arith.constant 0 : index
    %271 = vector.load %arg13[%c1_167, %c0_168, %c0_169] : memref<2x1x32xf32, #tpu.memory_space<vmem>>, vector<1x1x32xf32>
    %272 = vector.shape_cast %271 : vector<1x1x32xf32> to vector<1x32xf32>
    %cst_170 = arith.constant dense<0.000000e+00> : vector<16xf32>
    %273 = vector.multi_reduction <add>, %270, %cst_170 [1] : vector<16x32xf32> to vector<16xf32>
    %274 = vector.shape_cast %273 : vector<16xf32> to vector<16x1xf32>
    %cst_171 = arith.constant 3.200000e+01 : f32
    %275 = vector.broadcast %cst_171 : f32 to vector<16x1xf32>
    %276 = arith.divf %274, %275 : vector<16x1xf32>
    %277 = vector.broadcast %276 : vector<16x1xf32> to vector<16x32xf32>
    %278 = arith.subf %270, %277 : vector<16x32xf32>
    %279 = arith.mulf %278, %278 : vector<16x32xf32>
    %cst_172 = arith.constant dense<0.000000e+00> : vector<16xf32>
    %280 = vector.multi_reduction <add>, %279, %cst_172 [1] : vector<16x32xf32> to vector<16xf32>
    %281 = vector.shape_cast %280 : vector<16xf32> to vector<16x1xf32>
    %cst_173 = arith.constant 3.200000e+01 : f32
    %282 = vector.broadcast %cst_173 : f32 to vector<16x1xf32>
    %283 = arith.divf %281, %282 : vector<16x1xf32>
    %284 = vector.broadcast %276 : vector<16x1xf32> to vector<16x32xf32>
    %285 = arith.subf %270, %284 : vector<16x32xf32>
    %cst_174 = arith.constant 9.99999974E-6 : f32
    %286 = vector.broadcast %cst_174 : f32 to vector<16x1xf32>
    %287 = arith.addf %283, %286 : vector<16x1xf32>
    %288 = math.rsqrt %287 : vector<16x1xf32>
    %289 = vector.broadcast %288 : vector<16x1xf32> to vector<16x32xf32>
    %290 = arith.mulf %285, %289 : vector<16x32xf32>
    %291 = vector.broadcast %272 : vector<1x32xf32> to vector<16x32xf32>
    %292 = arith.mulf %290, %291 : vector<16x32xf32>
    %cst_175 = arith.constant 1.000000e+00 : f32
    %293 = vector.broadcast %cst_175 : f32 to vector<16x32xf32>
    %294 = arith.addf %293, %175 : vector<16x32xf32>
    %295 = arith.mulf %292, %294 : vector<16x32xf32>
    %296 = arith.addf %295, %173 : vector<16x32xf32>
    %297 = arith.truncf %296 : vector<16x32xf32> to vector<16x32xbf16>
    %c1_176 = arith.constant 1 : index
    %c0_177 = arith.constant 0 : index
    %c0_178 = arith.constant 0 : index
    %298 = vector.load %arg14[%c1_176, %c0_177, %c0_178] : memref<2x32x128xbf16, #tpu.memory_space<vmem>>, vector<1x32x128xbf16>
    %299 = vector.shape_cast %298 : vector<1x32x128xbf16> to vector<32x128xbf16>
    %cst_179 = arith.constant dense<0.000000e+00> : vector<16x128xf32>
    %300 = tpu.matmul %297, %299, %cst_179 {dimension_numbers = #tpu.dot_dimension_numbers<[1], [0], [0], [1], [0, 0, 1, 1], [], []>} : vector<16x32xbf16>, vector<32x128xbf16>, vector<16x128xf32> -> vector<16x128xf32>
    %c1_180 = arith.constant 1 : index
    %c0_181 = arith.constant 0 : index
    %c0_182 = arith.constant 0 : index
    %301 = vector.load %arg15[%c1_180, %c0_181, %c0_182] : memref<2x1x128xf32, #tpu.memory_space<vmem>>, vector<1x1x128xf32>
    %302 = vector.shape_cast %301 : vector<1x1x128xf32> to vector<1x128xf32>
    %303 = vector.broadcast %302 : vector<1x128xf32> to vector<16x128xf32>
    %304 = arith.addf %300, %303 : vector<16x128xf32>
    %cst_183 = arith.constant 5.000000e-01 : f32
    %305 = vector.broadcast %cst_183 : f32 to vector<16x128xf32>
    %306 = arith.mulf %305, %304 : vector<16x128xf32>
    %cst_184 = arith.constant 4.471500e-02 : f32
    %307 = vector.broadcast %cst_184 : f32 to vector<16x128xf32>
    %308 = arith.mulf %307, %304 : vector<16x128xf32>
    %309 = arith.mulf %308, %304 : vector<16x128xf32>
    %310 = arith.mulf %309, %304 : vector<16x128xf32>
    %311 = arith.addf %304, %310 : vector<16x128xf32>
    %cst_185 = arith.constant 0.797884583 : f32
    %312 = vector.broadcast %cst_185 : f32 to vector<16x128xf32>
    %313 = arith.mulf %312, %311 : vector<16x128xf32>
    %314 = math.tanh %313 : vector<16x128xf32>
    %cst_186 = arith.constant 1.000000e+00 : f32
    %315 = vector.broadcast %cst_186 : f32 to vector<16x128xf32>
    %316 = arith.addf %315, %314 : vector<16x128xf32>
    %317 = arith.mulf %306, %316 : vector<16x128xf32>
    %318 = arith.truncf %317 : vector<16x128xf32> to vector<16x128xbf16>
    %c1_187 = arith.constant 1 : index
    %c0_188 = arith.constant 0 : index
    %c0_189 = arith.constant 0 : index
    %319 = vector.load %arg16[%c1_187, %c0_188, %c0_189] : memref<2x128x32xbf16, #tpu.memory_space<vmem>>, vector<1x128x32xbf16>
    %320 = vector.shape_cast %319 : vector<1x128x32xbf16> to vector<128x32xbf16>
    %cst_190 = arith.constant dense<0.000000e+00> : vector<16x32xf32>
    %321 = tpu.matmul %318, %320, %cst_190 {dimension_numbers = #tpu.dot_dimension_numbers<[1], [0], [0], [1], [0, 0, 1, 1], [], []>} : vector<16x128xbf16>, vector<128x32xbf16>, vector<16x32xf32> -> vector<16x32xf32>
    %c1_191 = arith.constant 1 : index
    %c0_192 = arith.constant 0 : index
    %c0_193 = arith.constant 0 : index
    %322 = vector.load %arg17[%c1_191, %c0_192, %c0_193] : memref<2x1x32xf32, #tpu.memory_space<vmem>>, vector<1x1x32xf32>
    %323 = vector.shape_cast %322 : vector<1x1x32xf32> to vector<1x32xf32>
    %324 = vector.broadcast %323 : vector<1x32xf32> to vector<16x32xf32>
    %325 = arith.addf %321, %324 : vector<16x32xf32>
    %326 = arith.mulf %177, %325 : vector<16x32xf32>
    %327 = arith.addf %270, %326 : vector<16x32xf32>
    %c0_194 = arith.constant 0 : index
    %c0_195 = arith.constant 0 : index
    %328 = vector.load %arg18[%c0_194, %c0_195] : memref<1x32xf32, #tpu.memory_space<vmem>>, vector<1x32xf32>
    %cst_196 = arith.constant dense<0.000000e+00> : vector<16xf32>
    %329 = vector.multi_reduction <add>, %327, %cst_196 [1] : vector<16x32xf32> to vector<16xf32>
    %330 = vector.shape_cast %329 : vector<16xf32> to vector<16x1xf32>
    %cst_197 = arith.constant 3.200000e+01 : f32
    %331 = vector.broadcast %cst_197 : f32 to vector<16x1xf32>
    %332 = arith.divf %330, %331 : vector<16x1xf32>
    %333 = vector.broadcast %332 : vector<16x1xf32> to vector<16x32xf32>
    %334 = arith.subf %327, %333 : vector<16x32xf32>
    %335 = arith.mulf %334, %334 : vector<16x32xf32>
    %cst_198 = arith.constant dense<0.000000e+00> : vector<16xf32>
    %336 = vector.multi_reduction <add>, %335, %cst_198 [1] : vector<16x32xf32> to vector<16xf32>
    %337 = vector.shape_cast %336 : vector<16xf32> to vector<16x1xf32>
    %cst_199 = arith.constant 3.200000e+01 : f32
    %338 = vector.broadcast %cst_199 : f32 to vector<16x1xf32>
    %339 = arith.divf %337, %338 : vector<16x1xf32>
    %340 = vector.broadcast %332 : vector<16x1xf32> to vector<16x32xf32>
    %341 = arith.subf %327, %340 : vector<16x32xf32>
    %cst_200 = arith.constant 9.99999974E-6 : f32
    %342 = vector.broadcast %cst_200 : f32 to vector<16x1xf32>
    %343 = arith.addf %339, %342 : vector<16x1xf32>
    %344 = math.rsqrt %343 : vector<16x1xf32>
    %345 = vector.broadcast %344 : vector<16x1xf32> to vector<16x32xf32>
    %346 = arith.mulf %341, %345 : vector<16x32xf32>
    %347 = vector.broadcast %328 : vector<1x32xf32> to vector<16x32xf32>
    %348 = arith.mulf %346, %347 : vector<16x32xf32>
    %c1_201 = arith.constant 1 : index
    %c0_202 = arith.constant 0 : index
    %c0_203 = arith.constant 0 : index
    %349 = vector.load %arg2[%c1_201, %c0_202, %c0_203] : memref<2x16x32xf32, #tpu.memory_space<vmem>>, vector<1x16x32xf32>
    %350 = vector.shape_cast %349 : vector<1x16x32xf32> to vector<16x32xf32>
    %cst_204 = arith.constant 1.000000e+00 : f32
    %351 = vector.broadcast %cst_204 : f32 to vector<16x32xf32>
    %352 = arith.addf %351, %350 : vector<16x32xf32>
    %353 = arith.mulf %348, %352 : vector<16x32xf32>
    %c0_205 = arith.constant 0 : index
    %c0_206 = arith.constant 0 : index
    %c0_207 = arith.constant 0 : index
    %354 = vector.load %arg2[%c0_205, %c0_206, %c0_207] : memref<2x16x32xf32, #tpu.memory_space<vmem>>, vector<1x16x32xf32>
    %355 = vector.shape_cast %354 : vector<1x16x32xf32> to vector<16x32xf32>
    %356 = arith.addf %353, %355 : vector<16x32xf32>
    %357 = arith.truncf %356 : vector<16x32xf32> to vector<16x32xbf16>
    %c0_208 = arith.constant 0 : index
    %c0_209 = arith.constant 0 : index
    %358 = vector.load %arg19[%c0_208, %c0_209] : memref<32x128xbf16, #tpu.memory_space<vmem>>, vector<32x128xbf16>
    %cst_210 = arith.constant dense<0.000000e+00> : vector<16x128xf32>
    %359 = tpu.matmul %357, %358, %cst_210 {dimension_numbers = #tpu.dot_dimension_numbers<[1], [0], [0], [1], [0, 0, 1, 1], [], []>} : vector<16x32xbf16>, vector<32x128xbf16>, vector<16x128xf32> -> vector<16x128xf32>
    %c0_211 = arith.constant 0 : index
    %c0_212 = arith.constant 0 : index
    %360 = vector.load %arg20[%c0_211, %c0_212] : memref<1x128xf32, #tpu.memory_space<vmem>>, vector<1x128xf32>
    %361 = vector.broadcast %360 : vector<1x128xf32> to vector<16x128xf32>
    %362 = arith.addf %359, %361 : vector<16x128xf32>
    %c0_213 = arith.constant 0 : index
    %c0_214 = arith.constant 0 : index
    %363 = vector.load %arg21[%c0_213, %c0_214] : memref<16x128xf32, #tpu.memory_space<vmem>>, vector<16x128xf32>
    tpu.vector_store %arg21[%c0_213, %c0_214], %362 {strides = array<i32>} : memref<16x128xf32, #tpu.memory_space<vmem>>, vector<16x128xf32>,
    return
  }
}

</mosaic_0001>

<bundles_post_ra>
// kernel: dit_forward.1
= control target key start
LH: loop header
LB: loop body
LE: loop exit
PB: predicated region body
PF: predicated region fallthrough
CT: control target
= control target key end

     0   :  { %s3451_s0 = inlined_call_operand.vmem [shape: f32[16,32], index: 0, kind: input, shape index: {}]   ;;  %s3452_s1 = inlined_call_operand.vmem [shape: f32[2,6,16,32], index: 1, kind: input, shape index: {}]   ;;  %s3453_s2 = inlined_call_operand.vmem [shape: f32[2,16,32], index: 2, kind: input, shape index: {}]   ;;  %s3454_s3 = inlined_call_operand.vmem [shape: f32[16,32], index: 3, kind: input, shape index: {}]   ;;  %s3455_s4 = inlined_call_operand.vmem [shape: f32[16,32], index: 4, kind: input, shape index: {}]   ;;  %s3456_s5 = inlined_call_operand.vmem [shape: f32[2,32], index: 5, kind: input, shape index: {}]   ;;  %s3457_s6 = inlined_call_operand.vmem [shape: f32[2,32], index: 6, kind: input, shape index: {}]   ;;  %s3458_s7 = inlined_call_operand.vmem [shape: f32[16,16], index: 7, kind: input, shape index: {}]   ;;  %s3459_s8 = inlined_call_operand.vmem [shape: f32[2,1,32], index: 8, kind: input, shape index: {}]   ;;  %s3460_s9 = inlined_call_operand.vmem [shape: bf16[2,32,32], index: 9, kind: input, shape index: {}]   ;;  %s3461_s10 = inlined_call_operand.vmem [shape: bf16[2,32,32], index: 10, kind: input, shape index: {}]   ;;  %s3462_s11 = inlined_call_operand.vmem [shape: bf16[2,32,32], index: 11, kind: input, shape index: {}]   ;;  %s3463_s12 = inlined_call_operand.vmem [shape: bf16[2,32,32], index: 12, kind: input, shape index: {}]   ;;  %s3464_s13 = inlined_call_operand.vmem [shape: f32[2,1,32], index: 13, kind: input, shape index: {}]   ;;  %s3465_s14 = inlined_call_operand.vmem [shape: bf16[2,32,128], index: 14, kind: input, shape index: {}]   ;;  %s3466_s15 = inlined_call_operand.vmem [shape: f32[2,1,128], index: 15, kind: input, shape index: {}]   ;;  %s3467_s16 = inlined_call_operand.vmem [shape: bf16[2,128,32], index: 16, kind: input, shape index: {}]   ;;  %s3468_s17 = inlined_call_operand.vmem [shape: f32[2,1,32], index: 17, kind: input, shape index: {}]   ;;  %s3469_s18 = inlined_call_operand.vmem [shape: f32[1,32], index: 18, kind: input, shape index: {}]   ;;  %s3470_s19 = inlined_call_operand.vmem [shape: bf16[32,128], index: 19, kind: input, shape index: {}]   ;;  %s3471_s20 = inlined_call_operand.vmem [shape: f32[1,128], index: 20, kind: input, shape index: {}]   ;;  %s3472_s21 = inlined_call_operand.hbm [shape: f32[16,128], index: 21, kind: output, shape index: {}]  }
   0x1   :  { %3479 = sst [smem:[#allocation5_spill]] %s3451_s0 }
   0x2   :  { %3480 = sst [smem:[#allocation6_spill]] %s3452_s1 }
   0x3   :  { %3481 = sst [smem:[#allocation7_spill]] %s3453_s2 }
   0x4   :  { %3482 = sst [smem:[#allocation8_spill]] %s3454_s3 }
   0x5   :  { %3483 = sst [smem:[#allocation9_spill]] %s3455_s4 }
   0x6   :  { %3484 = sst [smem:[#allocation10_spill]] %s3456_s5 }
   0x7   :  { %s3485_s26 = sld [smem:[#allocation5_spill]]  ;;  %vm96_vm0 = vcmask 261120  }
   0xd   :  { %v2880_v0 = vld [vmem:[%s3485_s26] sm:$0xff]  ;;  %v2885_v1 = vld [vmem:[%s3485_s26 + $0x8] sm:$0xff] }
   0xe   :  { %v97_v2 = vsel %vm96_vm0, %v2880_v0, 0.0  ;;  %v100_v3 = vsel %vm96_vm0, %v2885_v1, 0.0 }
   0xf   :  { %98 = vadd.xlane.f32.xlu0 %v97_v2 }
  0x13   :  { %101 = vadd.xlane.f32.xlu0 %v100_v3 }
  0x14   :  { %26 = vsyncpa [#allocation3], 0  ;;  %v2639_v14 = vld [vmem:[%s3460_s9 + $0x8] sm:$0xff]   ;;  %v2759_v16 = vmov 0.0   ;;  %v2641_v17 = vld [vmem:[%s3460_s9] sm:$0xff]   ;;  %vm2760_vm1 = vmmov 0  }
  0x15   :  { %v2640_v15 = vld [vmem:[%s3462_s11 + $0x8] sm:$0xff]   ;;  %2447 = vmatprep.subr.bf16.mxu1 %v2759_v16  ;;  %2463 = vmatprep.subr.bf16.mxu0 %v2759_v16  ;;  %v2642_v18 = vld [vmem:[%s3462_s11] sm:$0xff]   ;;  %s3486_s2 = sld [smem:[#allocation6_spill]]  ;;  %s2761_s1 = smov 32   ;;  %vm315_vm2 = vcmask 1047808   ;;  %vm470_vm3 = vcmask 130048  }
  0x16   :  { %2448 = vmatpush3.bf16.msra.mxu1 %v2639_v14  ;;  %2464 = vmatpush3.bf16.msra.mxu0 %v2640_v15  ;;  %v2223_v27 = vld [vmem:[%s3459_s8] ss:$0 sm:$0xff]  ;;  %v2643_v42 = vld [vmem:[%s3461_s10 + $0x8] sm:$0xff]   ;;  %s3487_s26 = sld [smem:[#allocation9_spill]]  ;;  %s2762_s27 = smov 16  }
  0x17   :  { %2449 = vmatprep.subr.bf16.mxu1 %v2759_v16  ;;  %2465 = vmatprep.subr.bf16.mxu0 %v2759_v16  ;;  %v2644_v44 = vld [vmem:[%s3461_s10] sm:$0xff]   ;;  %s2763_s29 = smov 112   ;;  %s3488_s30 = sld [smem:[#allocation8_spill]] }
  0x18   :  { %2451 = vmatprep.mubr.msk.bf16.mxu1 %vm2760_vm1, %v2759_v16  ;;  %2467 = vmatprep.mubr.msk.bf16.mxu0 %vm2760_vm1, %v2759_v16  ;;  %s3489_s25 = sld [smem:[#allocation10_spill]] }
  0x1a   :  { %2450 = vmatpush3.bf16.msra.mxu1 %v2641_v17  ;;  %2466 = vmatpush3.bf16.msra.mxu0 %v2642_v18 }
  0x1b   :  { %2455 = vmatprep.subr.bf16.mxu1 %v2759_v16  ;;  %v2213_v26 = vld [vmem:[%s3486_s2 + $0x10] sm:$0xff]  ;;  %v2214_v29 = vld [vmem:[%s3486_s2 + $0x18] sm:$0xff]  ;;  %v78_v37 = vld [vmem:[%s3486_s2] sm:$0xff] }
  0x1c   :  { %v132_v31 = vadd.f32 1.0, %v2213_v26  ;;  %v133_v34 = vadd.f32 1.0, %v2214_v29  ;;  %v79_v38 = vld [vmem:[%s3486_s2 + $0x8] sm:$0xff] }
  0x1d   :  { %v75_v55 = vld [vmem:[%s3487_s26 + $0x8] sm:$0xff] }
  0x1e   :  { %v2996_v26 = vld [vmem:[%s3489_s25] ss:$0 sm:$0xff] }
  0x98   :  { %v99_v4 = vpop.xlane.xlu0 %98 }
  0x99   :  { %v104_v5 = vmul.f32 0.03125, %v99_v4  ;;  %v74_v4 = vld [vmem:[%s3487_s26] sm:$0xff] }
  0x9b   :  { %v106_v6 = vsub.f32 %v2880_v0, %v104_v5 }
  0x9c   :  { %v102_v7 = vpop.xlane.xlu0 %101 }
  0x9d   :  { %v105_v8 = vmul.f32 0.03125, %v102_v7  ;;  %v108_v9 = vmul.f32 %v106_v6, %v106_v6 }
  0x9f   :  { %v107_v10 = vsub.f32 %v2885_v1, %v105_v8  ;;  %v110_v11 = vsel %vm96_vm0, %v108_v9, 0.0 }
  0xa0   :  { %111 = vadd.xlane.f32.xlu1 %v110_v11 }
  0xa1   :  { %v109_v12 = vmul.f32 %v107_v10, %v107_v10 }
  0xa3   :  { %v113_v13 = vsel %vm96_vm0, %v109_v12, 0.0 }
  0xa4   :  { %114 = vadd.xlane.f32.xlu1 %v113_v13 }
 0x129   :  { %v112_v19 = vpop.xlane.xlu1 %111 }
 0x12a   :  { %v116_v20 = vmul.f32 0.03125, %v112_v19 }
 0x12c   :  { %v118_v21 = vadd.f32 1e-05, %v116_v20  ;;  %v2984_v20 = vld [vmem:[%s3488_s30 + $0x8] sm:$0xff] }
 0x12d   :  { %v115_v22 = vpop.xlane.xlu1 %114 }
 0x12e   :  { %2677 = vrsqrt.f32 %v118_v21  ;;  %v117_v23 = vmul.f32 0.03125, %v115_v22  ;;  %v2990_v22 = vld [vmem:[%s3488_s30] sm:$0xff]  ;;  %s3490_s30 = sld [smem:[#allocation7_spill]] }
 0x130   :  { %v119_v24 = vadd.f32 1e-05, %v117_v23 }
 0x132   :  { %2679 = vrsqrt.f32 %v119_v24 }
 0x13b   :  { %v2678_v25 = vpop.eup %2677 }
 0x13c   :  { %v122_v28 = vmul.f32 %v2678_v25, %v106_v6 }
 0x13e   :  { %v130_v30 = vmul.f32 %v2223_v27, %v122_v28 }
 0x13f   :  { %v2680_v32 = vpop.eup %2679 }
 0x140   :  { %v123_v33 = vmul.f32 %v2680_v32, %v107_v10  ;;  %v134_v36 = vmul.f32 %v132_v31, %v130_v30 }
 0x142   :  { %v131_v35 = vmul.f32 %v2223_v27, %v123_v33  ;;  %v136_v40 = vadd.f32 %v134_v36, %v78_v37  ;;  %v3001_v27 = vld [vmem:[%s3489_s25 + $0x1] ss:$0 sm:$0xff] }
 0x144   :  { %v135_v39 = vmul.f32 %v133_v34, %v131_v35 }
 0x146   :  { %v137_v41 = vadd.f32 %v135_v39, %v79_v38 }
 0x148   :  { %v138_v43 = vpack.c.bf16 %v137_v41, %v136_v40 }
 0x14a   :  { %2452 = vmatmul.mubr.msk.bf16.vlgmr.msra.gmra.mxu1 %vm96_vm0, %v138_v43  ;;  %2468 = vmatmul.mubr.msk.bf16.vlgmr.msra.gmra.mxu0 %vm96_vm0, %v138_v43 }
 0x14b   :  { %2456 = vmatpush3.bf16.msra.mxu1 %v2643_v42  ;;  %2459 = vmatprep.mubr.msk.bf16.mxu1 %vm2760_vm1, %v2759_v16  ;;  %v3016_v42 = vld [vmem:[%s3457_s6 + $0x1] ss:$0 sm:$0xff] }
 0x14c   :  { %2457 = vmatprep.subr.bf16.mxu1 %v2759_v16 }
 0x14f   :  { %2458 = vmatpush3.bf16.msra.mxu1 %v2644_v44 }
 0x152   :  { %2460 = vmatmul.mubr.msk.bf16.vlgmr.msra.gmra.mxu1 %vm96_vm0, %v138_v43 }
 0x20a   :  { %v192_v45 = vpop.f32.mrf.mxu1  ;;  %v2943_v46 = vpop.f32.mrf.mxu0 }
 0x20b   :  { %316 = vrot.lane.b32.xlu1 %v192_v45, %s2761_s1  ;;  %v313_v25 = vmul.f32 %v192_v45, %v2990_v22 }
 0x20c   :  { %v2453_v47 = vpop.f32.mrf.mxu1  ;;  %v2469_v48 = vpop.f32.mrf.mxu0 }
 0x20d   :  { %v617_v47 = vmul.f32 %v3016_v42, %v2943_v46  ;;  %v3034_v48 = vld [vmem:[%s3457_s6] ss:$0 sm:$0xff] }
 0x20e   :  { %v195_v49 = vpop.f32.mrf.mxu1  ;;  %v2946_v50 = vpop.f32.mrf.mxu0 }
 0x20f   :  { %319 = vrot.lane.b32.xlu1 %v195_v49, %s2761_s1  ;;  %v314_v29 = vmul.f32 %v195_v49, %v2984_v20  ;;  %v618_v43 = vmul.f32 %v3016_v42, %v2946_v50 }
 0x210   :  { %v2454_v51 = vpop.f32.mrf.mxu1  ;;  %v2470_v52 = vpop.f32.mrf.mxu0 }
 0x211   :  { %v3046_v51 = vld [vmem:[%s3458_s7 + $0x8] sm:$0xff] }
 0x212   :  { %v249_v53 = vpop.f32.mrf.mxu1 }
 0x213   :  { %350 = vrot.lane.b32.xlu1 %v249_v53, %s2761_s1  ;;  %v348_v35 = vmul.f32 %v249_v53, %v2990_v22 }
 0x214   :  { %v2461_v54 = vpop.f32.mrf.mxu1 }
 0x215   :  { %v3051_v54 = vld [vmem:[%s3458_s7] sm:$0xff] }
 0x216   :  { %v252_v56 = vpop.f32.mrf.mxu1 }
 0x217   :  { %353 = vrot.lane.b32.xlu0 %v252_v56, %s2761_s1  ;;  %332 = vrot.lane.b32.xlu1 %v75_v55, %s2762_s27  ;;  %v349_v21 = vmul.f32 %v252_v56, %v2984_v20 }
 0x218   :  { %v2462_v57 = vpop.f32.mrf.mxu1 }
 0x27d   :  { %v317_v58 = vpop.permute.xlu1 %316 }
 0x27e   :  { %v318_v59 = vsel %vm315_vm2, %v317_v58, %v192_v45 }
 0x27f   :  { %322 = vrot.lane.b32.xlu0 %v318_v59, %s2761_s1 }
 0x281   :  { %v320_v60 = vpop.permute.xlu1 %319 }
 0x282   :  { %v321_v61 = vsel %vm315_vm2, %v320_v60, %v195_v49 }
 0x283   :  { %324 = vrot.lane.b32.xlu1 %v321_v61, %s2761_s1 }
 0x285   :  { %v351_v62 = vpop.permute.xlu1 %350 }
 0x286   :  { %v352_v63 = vsel %vm315_vm2, %v351_v62, %v249_v53 }
 0x287   :  { %356 = vrot.lane.b32.xlu1 %v352_v63, %s2761_s1 }
 0x289   :  { %v354_v2 = vpop.permute.xlu0 %353  ;;  %v2965_v5 = vpop.permute.xlu1 %332 }
 0x28a   :  { %v355_v3 = vsel %vm315_vm2, %v354_v2, %v252_v56 }
 0x28b   :  { %358 = vrot.lane.b32.xlu0 %v355_v3, %s2761_s1 }
 0x28f   :  { %330 = vrot.lane.b32.xlu0 %v74_v4, %s2762_s27 }
 0x2f1   :  { %v323_v6 = vpop.permute.xlu0 %322 }
 0x2f2   :  { %v326_v12 = vsel %vm315_vm2, %v323_v6, %v192_v45 }
 0x2f5   :  { %v325_v7 = vpop.permute.xlu1 %324 }
 0x2f6   :  { %v327_v11 = vsel %vm315_vm2, %v325_v7, %v195_v49  ;;  %v3040_v49 = vmul.f32 %v3034_v48, %v2946_v50 }
 0x2f7   :  { %v337_v17 = vmul.f32 %v2965_v5, %v327_v11 }
 0x2f9   :  { %v357_v14 = vpop.permute.xlu1 %356 }
 0x2fa   :  { %v360_v18 = vsel %vm315_vm2, %v357_v14, %v249_v53 }
 0x2fd   :  { %v359_v8 = vpop.permute.xlu0 %358 }
 0x2fe   :  { %v361_v9 = vsel %vm315_vm2, %v359_v8, %v252_v56 }
 0x2ff   :  { %v363_v10 = vmul.f32 %v361_v9, %v2965_v5 }
 0x301   :  { %368 = vrot.lane.b32.xlu0 %v363_v10, %s2763_s29  ;;  %v2972_v13 = vpop.permute.xlu0 %330 }
 0x302   :  { %v336_v15 = vmul.f32 %v2972_v13, %v326_v12  ;;  %v362_v19 = vmul.f32 %v360_v18, %v2972_v13 }
 0x304   :  { %340 = vrot.lane.b32.xlu1 %v336_v15, %s2763_s29 }
 0x305   :  { %342 = vrot.lane.b32.xlu0 %v337_v17, %s2763_s29 }
 0x308   :  { %366 = vrot.lane.b32.xlu1 %v362_v19, %s2763_s29 }
 0x373   :  { %v369_v23 = vpop.permute.xlu0 %368 }
 0x374   :  { %v373_v24 = vadd.f32 %v369_v23, %v349_v21 }
 0x376   :  { %v341_v28 = vpop.permute.xlu1 %340  ;;  %2471 = vmatprep.subr.msk.mxu1 %vm96_vm0, %v373_v24  ;;  %2478 = vmatprep.subr.msk.mxu0 %vm96_vm0, %v373_v24 }
 0x377   :  { %v346_v30 = vadd.f32 %v341_v28, %v313_v25  ;;  %v343_v31 = vpop.permute.xlu0 %342  ;;  %2472 = vmatpush3.xpose.msk.msra.mxu1 %vm96_vm0, %v373_v24  ;;  %2479 = vmatpush3.xpose.msk.msra.mxu0 %vm96_vm0, %v373_v24 }
 0x378   :  { %v347_v32 = vadd.f32 %v343_v31, %v314_v29 }
 0x379   :  { %v379_v33 = vmul.f32 %v2996_v26, %v346_v30  ;;  %v505_v34 = vmul.f32 %v3001_v27, %v346_v30 }
 0x37a   :  { %v367_v36 = vpop.permute.xlu1 %366  ;;  %v380_v40 = vmul.f32 %v2996_v26, %v347_v32  ;;  %v506_v41 = vmul.f32 %v3001_v27, %v347_v32 }
 0x37b   :  { %v381_v37 = vmul.f32 0.25, %v379_v33  ;;  %v507_v38 = vmul.f32 0.25, %v505_v34  ;;  %v372_v39 = vadd.f32 %v367_v36, %v348_v35 }
 0x37c   :  { %v382_v44 = vmul.f32 0.25, %v380_v40  ;;  %v508_v45 = vmul.f32 0.25, %v506_v41 }
 0x37d   :  { %2473 = vmatprep.subr.msk.mxu1 %vm96_vm0, %v372_v39  ;;  %2475 = vmatprep.mubr.msk.f32.mxu1 %vm96_vm0, %v381_v37 }
 0x37e   :  { %2480 = vmatprep.subr.msk.mxu0 %vm96_vm0, %v372_v39  ;;  %2482 = vmatprep.mubr.msk.f32.mxu0 %vm96_vm0, %v507_v38  ;;  %v498_v38 = vmul.f32 %v3034_v48, %v2943_v46  ;;  %v2645_v46 = vld [vmem:[%s3463_s12 + $0x8] sm:$0xff]  }
 0x37f   :  { %2474 = vmatpush3.xpose.msk.msra.mxu1 %vm96_vm0, %v372_v39  ;;  %2481 = vmatpush3.xpose.msk.msra.mxu0 %vm96_vm0, %v372_v39 }
 0x380   :  { %2485 = vmatprep.subr.mxu1 %v618_v43  ;;  %2499 = vmatprep.subr.bf16.mxu0 %v2759_v16 }
 0x382   :  { %2476 = vmatmul.mubr.msk.f32.vlgmr.msra.gmra.mxu1 %vm96_vm0, %v382_v44  ;;  %2483 = vmatmul.mubr.msk.f32.vlgmr.msra.gmra.mxu0 %vm96_vm0, %v508_v45 }
 0x383   :  { %2486 = vmatpush3.msra.mxu1 %v618_v43  ;;  %2503 = vmatprep.mubr.msk.bf16.mxu0 %vm2760_vm1, %v2759_v16  ;;  %v2646_v43 = vld [vmem:[%s3463_s12] sm:$0xff]  }
 0x384   :  { %2487 = vmatprep.subr.mxu1 %v617_v47  ;;  %2500 = vmatpush3.bf16.msra.mxu0 %v2645_v46 }
 0x385   :  { %2488 = vmatpush3.msra.mxu1 %v617_v47  ;;  %2501 = vmatprep.subr.bf16.mxu0 %v2759_v16 }
 0x386   :  { %2492 = vmatprep.subr.mxu1 %v3040_v49 }
 0x388   :  { %2502 = vmatpush3.bf16.msra.mxu0 %v2646_v43 }
 0x389   :  { %2515 = vmatprep.subr.bf16.mxu0 %v2759_v16 }
 0x442   :  { %v2477_v52 = vpop.f32.mrf.mxu1  ;;  %v2484_v53 = vpop.f32.mrf.mxu0 }
 0x443   :  { %v587_v50 = vadd.f32 %v2484_v53, %v3046_v51  ;;  %v467_v61 = vadd.f32 %v2477_v52, %v3046_v51 }
 0x444   :  { %v461_v55 = vpop.f32.mrf.mxu1  ;;  %v581_v56 = vpop.f32.mrf.mxu0 }
 0x445   :  { %v582_v57 = vadd.f32 %v581_v56, %v3051_v54  ;;  %v593_v58 = vsel %vm470_vm3, %v587_v50, -inf  ;;  %v462_v59 = vadd.f32 %v461_v55, %v3051_v54  ;;  %v474_v63 = vsel %vm470_vm3, %v467_v61, -inf  ;;  %v2215_v55 = vld [vmem:[%s3486_s2 + $0x20] sm:$0xff] }
 0x446   :  { %594 = vmax.xlane.f32.xlu1 %v593_v58 }
 0x447   :  { %v590_v60 = vsel %vm470_vm3, %v582_v57, -inf  ;;  %v471_v62 = vsel %vm470_vm3, %v462_v59, -inf }
 0x448   :  { %591 = vmax.xlane.f32.xlu0 %v590_v60 }
 0x44c   :  { %472 = vmax.xlane.f32.xlu0 %v471_v62 }
 0x450   :  { %475 = vmax.xlane.f32.xlu0 %v474_v63 }
 0x4cf   :  { %v595_v2 = vpop.xlane.xlu1 %594 }
 0x4d0   :  { %v597_v3 = vsub.f32 %v587_v50, %v595_v2 }
 0x4d1   :  { %v592_v4 = vpop.xlane.xlu0 %591 }
 0x4d2   :  { %v600_v6 = vmul.f32 1.442695, %v597_v3  ;;  %v596_v7 = vsub.f32 %v582_v57, %v592_v4 }
 0x4d4   :  { %2681 = vpow2.f32 %v600_v6  ;;  %v598_v8 = vmul.f32 1.442695, %v596_v7 }
 0x4d5   :  { %v473_v9 = vpop.xlane.xlu0 %472 }
 0x4d6   :  { %2683 = vpow2.f32 %v598_v8  ;;  %v477_v10 = vsub.f32 %v462_v59, %v473_v9  ;;  %v2216_v59 = vld [vmem:[%s3486_s2 + $0x28] sm:$0xff] }
 0x4d8   :  { %v479_v11 = vmul.f32 1.442695, %v477_v10 }
 0x4d9   :  { %v476_v12 = vpop.xlane.xlu0 %475 }
 0x4da   :  { %2685 = vpow2.f32 %v479_v11  ;;  %v478_v14 = vsub.f32 %v467_v61, %v476_v12 }
 0x4dc   :  { %v481_v15 = vmul.f32 1.442695, %v478_v14 }
 0x4de   :  { %2687 = vpow2.f32 %v481_v15  ;;  %v2647_v15 = vld [vmem:[%s3465_s14 + $0x8] sm:$0xff]  }
 0x4e1   :  { %v2682_v17 = vpop.eup %2681 }
 0x4e2   :  { %v605_v18 = vsel %vm470_vm3, %v2682_v17, 0.0 }
 0x4e3   :  { %v2684_v19 = vpop.eup %2683  ;;  %606 = vadd.xlane.f32.xlu1 %v605_v18 }
 0x4e4   :  { %v602_v21 = vsel %vm470_vm3, %v2684_v19, 0.0 }
 0x4e5   :  { %603 = vadd.xlane.f32.xlu0 %v602_v21 }
 0x4e7   :  { %v2686_v23 = vpop.eup %2685 }
 0x4e8   :  { %v483_v24 = vsel %vm470_vm3, %v2686_v23, 0.0 }
 0x4e9   :  { %484 = vadd.xlane.f32.xlu0 %v483_v24 }
 0x4eb   :  { %v2688_v25 = vpop.eup %2687 }
 0x4ec   :  { %v486_v28 = vsel %vm470_vm3, %v2688_v25, 0.0 }
 0x4ed   :  { %487 = vadd.xlane.f32.xlu1 %v486_v28 }
 0x56c   :  { %v607_v29 = vpop.xlane.xlu1 %606 }
 0x56d   :  { %2689 = vrcp.f32 %v607_v29  ;;  %v2252_v29 = vld [vmem:[%s3464_s13] ss:$0 sm:$0xff] }
 0x56e   :  { %v604_v30 = vpop.xlane.xlu0 %603 }
 0x56f   :  { %2691 = vrcp.f32 %v604_v30  ;;  %v2219_v30 = vld [vmem:[%s3486_s2 + $0x40] sm:$0xff] }
 0x572   :  { %v485_v31 = vpop.xlane.xlu0 %484 }
 0x573   :  { %2693 = vrcp.f32 %v485_v31 }
 0x576   :  { %v488_v32 = vpop.xlane.xlu1 %487 }
 0x577   :  { %2695 = vrcp.f32 %v488_v32  ;;  %v2220_v32 = vld [vmem:[%s3486_s2 + $0x48] sm:$0xff] }
 0x57a   :  { %v2690_v33 = vpop.eup %2689 }
 0x57b   :  { %v611_v36 = vmul.f32 %v2690_v33, %v2682_v17  ;;  %v2648_v17 = vld [vmem:[%s3465_s14] sm:$0xff]  }
 0x57c   :  { %v2692_v34 = vpop.eup %2691 }
 0x57d   :  { %v609_v35 = vmul.f32 %v2692_v34, %v2684_v19  ;;  %v881_v34 = vadd.f32 1.0, %v2219_v30  ;;  %v2221_v30 = vld [vmem:[%s3486_s2 + $0x50] sm:$0xff] }
 0x57f   :  { %2489 = vmatprep.mubr.msk.f32.mxu1 %vm470_vm3, %v609_v35 }
 0x580   :  { %v2694_v37 = vpop.eup %2693  ;;  %2490 = vmatmul.mubr.msk.f32.vlgmr.msra.gmra.mxu1 %vm470_vm3, %v611_v36 }
 0x581   :  { %2493 = vmatpush3.msra.mxu1 %v3040_v49  ;;  %v490_v39 = vmul.f32 %v2694_v37, %v2686_v23  ;;  %v882_v37 = vadd.f32 1.0, %v2220_v32 }
 0x582   :  { %2494 = vmatprep.subr.mxu1 %v498_v38 }
 0x583   :  { %2495 = vmatpush3.msra.mxu1 %v498_v38  ;;  %2496 = vmatprep.mubr.msk.f32.mxu1 %vm470_vm3, %v490_v39 }
 0x584   :  { %v2696_v40 = vpop.eup %2695  ;;  %2507 = vmatprep.subr.bf16.mxu1 %v2759_v16 }
 0x585   :  { %v492_v41 = vmul.f32 %v2696_v40, %v2688_v25  ;;  %v2217_v40 = vld [vmem:[%s3486_s2 + $0x30] sm:$0xff] }
 0x587   :  { %2497 = vmatmul.mubr.msk.f32.vlgmr.msra.gmra.mxu1 %vm470_vm3, %v492_v41  ;;  %v2218_v41 = vld [vmem:[%s3486_s2 + $0x38] sm:$0xff] }
 0x588   :  { %2511 = vmatprep.mubr.msk.bf16.mxu1 %vm2760_vm1, %v2759_v16  ;;  %2508 = vmatpush3.bf16.msra.mxu1 %v2647_v15 }
 0x589   :  { %2509 = vmatprep.subr.bf16.mxu1 %v2759_v16 }
 0x58c   :  { %2510 = vmatpush3.bf16.msra.mxu1 %v2648_v17 }
 0x58d   :  { %2535 = vmatprep.subr.bf16.mxu1 %v2759_v16 }
 0x640   :  { %v2491_v44 = vpop.f32.mrf.mxu1 }
 0x642   :  { %v691_v45 = vpop.f32.mrf.mxu1 }
 0x647   :  { %v2498_v47 = vpop.f32.mrf.mxu1 }
 0x648   :  { %v778_v52 = vadd.f32 %v2498_v47, %v2491_v44  ;;  %v2649_v47 = vld [vmem:[%s3467_s16 + $0x38] sm:$0xff]  }
 0x649   :  { %v772_v49 = vpop.f32.mrf.mxu1 }
 0x64a   :  { %v773_v53 = vadd.f32 %v772_v49, %v691_v45  ;;  %v2650_v49 = vld [vmem:[%s3467_s16 + $0x30] sm:$0xff]  }
 0x64c   :  { %v781_v50 = vpack.c.bf16 %v778_v52, %v773_v53  ;;  %v2651_v52 = vld [vmem:[%s3467_s16 + $0x28] sm:$0xff]   ;;  %v2652_v53 = vld [vmem:[%s3467_s16 + $0x20] sm:$0xff]  }
 0x64e   :  { %2504 = vmatmul.mubr.msk.bf16.vlgmr.msra.gmra.mxu0 %vm96_vm0, %v781_v50  ;;  %v2653_v50 = vld [vmem:[%s3467_s16 + $0x18] sm:$0xff]  }
 0x64f   :  { %2531 = vmatprep.mubr.msk.bf16.mxu0 %vm2760_vm1, %v2759_v16  ;;  %2516 = vmatpush3.bf16.msra.mxu0 %v2649_v47 }
 0x650   :  { %2517 = vmatprep.subr.bf16.mxu0 %v2759_v16 }
 0x653   :  { %2518 = vmatpush3.bf16.msra.mxu0 %v2650_v49 }
 0x654   :  { %2519 = vmatprep.subr.bf16.mxu0 %v2759_v16 }
 0x657   :  { %2520 = vmatpush3.bf16.msra.mxu0 %v2651_v52 }
 0x658   :  { %2521 = vmatprep.subr.bf16.mxu0 %v2759_v16 }
 0x65b   :  { %2522 = vmatpush3.bf16.msra.mxu0 %v2652_v53 }
 0x65c   :  { %2523 = vmatprep.subr.bf16.mxu0 %v2759_v16 }
 0x65f   :  { %2524 = vmatpush3.bf16.msra.mxu0 %v2653_v50 }
 0x660   :  { %2525 = vmatprep.subr.bf16.mxu0 %v2759_v16 }
 0x70e   :  { %v835_v56 = vpop.f32.mrf.mxu0 }
 0x70f   :  { %v842_v57 = vmul.f32 %v2215_v55, %v835_v56  ;;  %v2654_v55 = vld [vmem:[%s3467_s16 + $0x10] sm:$0xff]   ;;  %v2655_v56 = vld [vmem:[%s3467_s16 + $0x8] sm:$0xff]  }
 0x710   :  { %v2505_v58 = vpop.f32.mrf.mxu0  ;;  %2526 = vmatpush3.bf16.msra.mxu0 %v2654_v55 }
 0x711   :  { %v3093_v60 = vadd.f32 %v842_v57, %v2880_v0  ;;  %2527 = vmatprep.subr.bf16.mxu0 %v2759_v16  ;;  %v2656_v57 = vld [vmem:[%s3467_s16] sm:$0xff]  }
 0x712   :  { %v838_v61 = vpop.f32.mrf.mxu0  ;;  %v2253_v58 = vld [vmem:[%s3466_s15] ss:$0 sm:$0xff] }
 0x713   :  { %v843_v62 = vmul.f32 %v2216_v59, %v838_v61  ;;  %v847_v63 = vsel %vm96_vm0, %v3093_v60, 0.0 }
 0x714   :  { %848 = vadd.xlane.f32.xlu0 %v847_v63  ;;  %v2506_v2 = vpop.f32.mrf.mxu0  ;;  %2528 = vmatpush3.bf16.msra.mxu0 %v2655_v56  ;;  %v2657_v56 = vld [vmem:[%s3460_s9 + $0x18] sm:$0xff]  }
 0x715   :  { %v3098_v3 = vadd.f32 %v843_v62, %v2885_v1  ;;  %2529 = vmatprep.subr.bf16.mxu0 %v2759_v16 }
 0x717   :  { %v850_v4 = vsel %vm96_vm0, %v3098_v3, 0.0 }
 0x718   :  { %851 = vadd.xlane.f32.xlu1 %v850_v4  ;;  %2530 = vmatpush3.bf16.msra.mxu0 %v2656_v57  ;;  %v2658_v57 = vld [vmem:[%s3460_s9 + $0x10] sm:$0xff]  }
 0x79d   :  { %v849_v6 = vpop.xlane.xlu0 %848 }
 0x79e   :  { %v853_v7 = vmul.f32 0.03125, %v849_v6 }
 0x7a0   :  { %v855_v8 = vsub.f32 %v3093_v60, %v853_v7 }
 0x7a1   :  { %v852_v0 = vpop.xlane.xlu1 %851 }
 0x7a2   :  { %v854_v9 = vmul.f32 0.03125, %v852_v0  ;;  %v857_v10 = vmul.f32 %v855_v8, %v855_v8 }
 0x7a4   :  { %v856_v11 = vsub.f32 %v3098_v3, %v854_v9  ;;  %v859_v12 = vsel %vm96_vm0, %v857_v10, 0.0 }
 0x7a5   :  { %860 = vadd.xlane.f32.xlu0 %v859_v12 }
 0x7a6   :  { %v858_v14 = vmul.f32 %v856_v11, %v856_v11 }
 0x7a8   :  { %v862_v1 = vsel %vm96_vm0, %v858_v14, 0.0 }
 0x7a9   :  { %863 = vadd.xlane.f32.xlu1 %v862_v1 }
 0x82e   :  { %v861_v18 = vpop.xlane.xlu0 %860 }
 0x82f   :  { %v865_v19 = vmul.f32 0.03125, %v861_v18 }
 0x831   :  { %v867_v21 = vadd.f32 1e-05, %v865_v19 }
 0x832   :  { %v864_v23 = vpop.xlane.xlu1 %863 }
 0x833   :  { %2697 = vrsqrt.f32 %v867_v21  ;;  %v866_v24 = vmul.f32 0.03125, %v864_v23 }
 0x835   :  { %v868_v25 = vadd.f32 1e-05, %v866_v24 }
 0x837   :  { %2699 = vrsqrt.f32 %v868_v25 }
 0x840   :  { %v2698_v28 = vpop.eup %2697 }
 0x841   :  { %v871_v31 = vmul.f32 %v2698_v28, %v855_v8 }
 0x843   :  { %v879_v33 = vmul.f32 %v2252_v29, %v871_v31 }
 0x844   :  { %v2700_v35 = vpop.eup %2699 }
 0x845   :  { %v872_v36 = vmul.f32 %v2700_v35, %v856_v11  ;;  %v883_v39 = vmul.f32 %v881_v34, %v879_v33  ;;  %v2222_v35 = vld [vmem:[%s3486_s2 + $0x58] sm:$0xff] }
 0x847   :  { %v880_v38 = vmul.f32 %v2252_v29, %v872_v36  ;;  %v885_v43 = vadd.f32 %v2217_v40, %v883_v39  ;;  %v2257_v29 = vld [vmem:[%s3468_s17] ss:$0 sm:$0xff] }
 0x849   :  { %v884_v46 = vmul.f32 %v882_v37, %v880_v38 }
 0x84b   :  { %v886_v44 = vadd.f32 %v2218_v41, %v884_v46 }
 0x84d   :  { %v887_v45 = vpack.c.bf16 %v886_v44, %v885_v43 }
 0x84f   :  { %2512 = vmatmul.mubr.msk.bf16.vlgmr.msra.gmra.mxu1 %vm96_vm0, %v887_v45 }
 0x850   :  { %2539 = vmatprep.mubr.msk.bf16.mxu1 %vm2760_vm1, %v2759_v16  ;;  %2536 = vmatpush3.bf16.msra.mxu1 %v2657_v56 }
 0x851   :  { %2537 = vmatprep.subr.bf16.mxu1 %v2759_v16 }
 0x854   :  { %2538 = vmatpush3.bf16.msra.mxu1 %v2658_v57 }
 0x855   :  { %2543 = vmatprep.subr.bf16.mxu1 %v2759_v16 }
 0x90f   :  { %v948_v59 = vpop.f32.mrf.mxu1 }
 0x910   :  { %v949_v61 = vadd.f32 %v2253_v58, %v948_v59 }
 0x911   :  { %v2513_v62 = vpop.f32.mrf.mxu1 }
 0x912   :  { %v957_v63 = vmul.f32 0.044715, %v949_v61  ;;  %v955_v19 = vmul.f32 0.5, %v949_v61 }
 0x913   :  { %v951_v2 = vpop.f32.mrf.mxu1 }
 0x914   :  { %v959_v4 = vmul.f32 %v957_v63, %v949_v61  ;;  %v952_v6 = vadd.f32 %v2253_v58, %v951_v2 }
 0x915   :  { %v2514_v7 = vpop.f32.mrf.mxu1 }
 0x916   :  { %v961_v8 = vmul.f32 %v959_v4, %v949_v61  ;;  %v958_v0 = vmul.f32 0.044715, %v952_v6  ;;  %v956_v21 = vmul.f32 0.5, %v952_v6  ;;  %v2268_v7 = vld [vmem:[%s3486_s2 + $0x70] sm:$0xff] }
 0x918   :  { %v963_v9 = vadd.f32 %v961_v8, %v949_v61  ;;  %v960_v10 = vmul.f32 %v958_v0, %v952_v6  ;;  %v2269_v0 = vld [vmem:[%s3486_s2 + $0x78] sm:$0xff] }
 0x91a   :  { %v965_v11 = vmul.f32 0.7978846, %v963_v9  ;;  %v962_v12 = vmul.f32 %v960_v10, %v952_v6  ;;  %v1144_v10 = vadd.f32 1.0, %v2268_v7 }
 0x91c   :  { %2701 = vtanh.f32 %v965_v11  ;;  %v964_v14 = vadd.f32 %v962_v12, %v952_v6  ;;  %v2279_v6 = vld [vmem:[%s3459_s8 + $0x1] ss:$0 sm:$0xff]  ;;  %s2764_s8 = smov [#allocation2]  }
 0x91d   :  { %s2202_s23 = sshll.u32 %s2764_s8, 4  ;;  %s2203_s23 = int_to_ptr.vmem [resolvable:$true] %s2202_s23 }
 0x91e   :  { %v966_v1 = vmul.f32 0.7978846, %v964_v14  ;;  %v1145_v14 = vadd.f32 1.0, %v2269_v0  ;;  %s2737_s24 = scalar_lea.vmem %s2203_s23, 256  ;;  %p2742_p1 = scmp.lt.s32.totalorder %s2203_s23, %s2203_s23 }
 0x91f   :  { %p2738_p0 = scmp.ne.s32.totalorder %s2203_s23, %s2737_s24  ;;  %p2743_p2 = scmp.lt.s32.totalorder %s2737_s24, %s2737_s24 }
 0x920   :  { %2703 = vtanh.f32 %v966_v1 }
 0x921   :  { %p2744_p3 = por %p2743_p2, %p2742_p1 }
 0x923   :  { %p2745_p4 = pnand %p2744_p3, %p2738_p0 }
 0x929   :  { %v2702_v15 = vpop.eup %2701 }
 0x92a   :  { %v969_v17 = vadd.f32 1.0, %v2702_v15 }
 0x92c   :  { %v971_v24 = vmul.f32 %v969_v17, %v955_v19  ;;  %v2266_v17 = vld [vmem:[%s3486_s2 + $0x60] sm:$0xff] }
 0x92d   :  { %v2704_v18 = vpop.eup %2703 }
 0x92e   :  { %v970_v23 = vadd.f32 1.0, %v2704_v18  ;;  %v2267_v18 = vld [vmem:[%s3486_s2 + $0x68] sm:$0xff] }
 0x930   :  { %v972_v25 = vmul.f32 %v970_v23, %v956_v21 }
 0x932   :  { %v973_v28 = vpack.c.bf16 %v972_v25, %v971_v24  ;;  %v2659_v24 = vld [vmem:[%s3461_s10 + $0x18] sm:$0xff]  }
 0x934   :  { %2532 = vmatmul.mubr.bf16.vlgmr.msra.gmra.mxu0 %v973_v28  ;;  %v2660_v28 = vld [vmem:[%s3461_s10 + $0x10] sm:$0xff]  }
 0x9f4   :  { %v1079_v31 = vpop.f32.mrf.mxu0 }
 0x9f5   :  { %v1080_v32 = vadd.f32 %v2257_v29, %v1079_v31 }
 0x9f6   :  { %v2533_v33 = vpop.f32.mrf.mxu0 }
 0x9f7   :  { %v1086_v34 = vmul.f32 %v2221_v30, %v1080_v32  ;;  %v2662_v30 = vld [vmem:[%s3462_s11 + $0x10] sm:$0xff]  }
 0x9f8   :  { %v1082_v36 = vpop.f32.mrf.mxu0 }
 0x9f9   :  { %v3176_v37 = vadd.f32 %v1086_v34, %v3093_v60  ;;  %v1083_v38 = vadd.f32 %v2257_v29, %v1082_v36  ;;  %v2661_v29 = vld [vmem:[%s3462_s11 + $0x18] sm:$0xff]  }
 0x9fa   :  { %v2534_v39 = vpop.f32.mrf.mxu0 }
 0x9fb   :  { %v1087_v40 = vmul.f32 %v2222_v35, %v1083_v38  ;;  %v1110_v41 = vsel %vm96_vm0, %v3176_v37, 0.0 }
 0x9fc   :  { %1111 = vadd.xlane.f32.xlu0 %v1110_v41 }
 0x9fd   :  { %v3181_v46 = vadd.f32 %v1087_v40, %v3098_v3 }
 0x9ff   :  { %v1113_v43 = vsel %vm96_vm0, %v3181_v46, 0.0 }
 0xa00   :  { %1114 = vadd.xlane.f32.xlu1 %v1113_v43 }
 0xa85   :  { %v1112_v44 = vpop.xlane.xlu0 %1111 }
 0xa86   :  { %v1116_v45 = vmul.f32 0.03125, %v1112_v44 }
 0xa88   :  { %v1118_v47 = vsub.f32 %v3176_v37, %v1116_v45 }
 0xa89   :  { %v1115_v60 = vpop.xlane.xlu1 %1114 }
 0xa8a   :  { %v1117_v49 = vmul.f32 0.03125, %v1115_v60  ;;  %v1120_v52 = vmul.f32 %v1118_v47, %v1118_v47 }
 0xa8c   :  { %v1119_v53 = vsub.f32 %v3181_v46, %v1117_v49  ;;  %v1122_v50 = vsel %vm96_vm0, %v1120_v52, 0.0 }
 0xa8d   :  { %1123 = vadd.xlane.f32.xlu0 %v1122_v50 }
 0xa8e   :  { %v1121_v55 = vmul.f32 %v1119_v53, %v1119_v53 }
 0xa90   :  { %v1125_v3 = vsel %vm96_vm0, %v1121_v55, 0.0 }
 0xa91   :  { %1126 = vadd.xlane.f32.xlu1 %v1125_v3 }
 0xb16   :  { %v1124_v58 = vpop.xlane.xlu0 %1123 }
 0xb17   :  { %v1128_v59 = vmul.f32 0.03125, %v1124_v58 }
 0xb19   :  { %v1130_v61 = vadd.f32 1e-05, %v1128_v59 }
 0xb1a   :  { %v1127_v62 = vpop.xlane.xlu1 %1126 }
 0xb1b   :  { %2705 = vrsqrt.f32 %v1130_v61  ;;  %v1129_v63 = vmul.f32 0.03125, %v1127_v62 }
 0xb1d   :  { %v1131_v2 = vadd.f32 1e-05, %v1129_v63 }
 0xb1f   :  { %2707 = vrsqrt.f32 %v1131_v2 }
 0xb28   :  { %v2706_v4 = vpop.eup %2705 }
 0xb29   :  { %v1134_v8 = vmul.f32 %v2706_v4, %v1118_v47 }
 0xb2b   :  { %v1142_v9 = vmul.f32 %v2279_v6, %v1134_v8 }
 0xb2c   :  { %v2708_v11 = vpop.eup %2707 }
 0xb2d   :  { %v1135_v12 = vmul.f32 %v2708_v11, %v1119_v53  ;;  %v1146_v15 = vmul.f32 %v1144_v10, %v1142_v9 }
 0xb2f   :  { %v1143_v1 = vmul.f32 %v2279_v6, %v1135_v12  ;;  %v1148_v21 = vadd.f32 %v2266_v17, %v1146_v15 }
 0xb31   :  { %v1147_v19 = vmul.f32 %v1145_v14, %v1143_v1 }
 0xb33   :  { %v1149_v23 = vadd.f32 %v2267_v18, %v1147_v19 }
 0xb35   :  { %v1150_v25 = vpack.c.bf16 %v1149_v23, %v1148_v21 }
 0xb37   :  { %2540 = vmatmul.mubr.msk.bf16.vlgmr.msra.gmra.mxu1 %vm96_vm0, %v1150_v25 }
 0xb38   :  { %2544 = vmatpush3.bf16.msra.mxu1 %v2659_v24  ;;  %2547 = vmatprep.mubr.msk.bf16.mxu1 %vm2760_vm1, %v2759_v16 }
 0xb39   :  { %2545 = vmatprep.subr.bf16.mxu1 %v2759_v16 }
 0xb3c   :  { %2546 = vmatpush3.bf16.msra.mxu1 %v2660_v28 }
 0xb3d   :  { %2551 = vmatprep.subr.bf16.mxu1 %v2759_v16 }
 0xb3f   :  { %2548 = vmatmul.mubr.msk.bf16.vlgmr.msra.gmra.mxu1 %vm96_vm0, %v1150_v25 }
 0xb40   :  { %2552 = vmatpush3.bf16.msra.mxu1 %v2661_v29  ;;  %2555 = vmatprep.mubr.msk.bf16.mxu1 %vm2760_vm1, %v2759_v16 }
 0xb41   :  { %2553 = vmatprep.subr.bf16.mxu1 %v2759_v16 }
 0xb44   :  { %2554 = vmatpush3.bf16.msra.mxu1 %v2662_v30 }
 0xb47   :  { %2556 = vmatmul.mubr.msk.bf16.vlgmr.msra.gmra.mxu1 %vm96_vm0, %v1150_v25 }
 0xbf7   :  { %v1205_v31 = vpop.f32.mrf.mxu1 }
 0xbf8   :  { %1330 = vrot.lane.b32.xlu1 %v1205_v31, %s2761_s1  ;;  %v1328_v8 = vmul.f32 %v1205_v31, %v2990_v22 }
 0xbf9   :  { %v2541_v32 = vpop.f32.mrf.mxu1 }
 0xbfb   :  { %v1208_v33 = vpop.f32.mrf.mxu1 }
 0xbfc   :  { %1333 = vrot.lane.b32.xlu1 %v1208_v33, %s2761_s1  ;;  %v1329_v19 = vmul.f32 %v1208_v33, %v2984_v20 }
 0xbfd   :  { %v2542_v34 = vpop.f32.mrf.mxu1 }
 0xbff   :  { %v1263_v35 = vpop.f32.mrf.mxu1 }
 0xc00   :  { %1356 = vrot.lane.b32.xlu1 %v1263_v35, %s2761_s1  ;;  %v1354_v15 = vmul.f32 %v1263_v35, %v2990_v22 }
 0xc01   :  { %v2549_v36 = vpop.f32.mrf.mxu1 }
 0xc03   :  { %v1266_v38 = vpop.f32.mrf.mxu1 }
 0xc04   :  { %1359 = vrot.lane.b32.xlu0 %v1266_v38, %s2761_s1  ;;  %v1355_v14 = vmul.f32 %v1266_v38, %v2984_v20 }
 0xc05   :  { %v2550_v39 = vpop.f32.mrf.mxu1 }
 0xc07   :  { %v3238_v40 = vpop.f32.mrf.mxu1 }
 0xc08   :  { %v1602_v29 = vmul.f32 %v3016_v42, %v3238_v40 }
 0xc09   :  { %v2557_v41 = vpop.f32.mrf.mxu1 }
 0xc0b   :  { %v3240_v43 = vpop.f32.mrf.mxu1 }
 0xc0c   :  { %v1603_v22 = vmul.f32 %v3016_v42, %v3240_v43 }
 0xc0d   :  { %v2558_v44 = vpop.f32.mrf.mxu1 }
 0xc6a   :  { %v1331_v45 = vpop.permute.xlu1 %1330 }
 0xc6b   :  { %v1332_v47 = vsel %vm315_vm2, %v1331_v45, %v1205_v31 }
 0xc6c   :  { %1336 = vrot.lane.b32.xlu1 %v1332_v47, %s2761_s1 }
 0xc6e   :  { %v1334_v60 = vpop.permute.xlu1 %1333 }
 0xc6f   :  { %v1335_v55 = vsel %vm315_vm2, %v1334_v60, %v1208_v33 }
 0xc72   :  { %v1357_v49 = vpop.permute.xlu1 %1356 }
 0xc73   :  { %v1358_v52 = vsel %vm315_vm2, %v1357_v49, %v1263_v35 }
 0xc74   :  { %1362 = vrot.lane.b32.xlu1 %v1358_v52, %s2761_s1 }
 0xc76   :  { %v1360_v53 = vpop.permute.xlu0 %1359 }
 0xc77   :  { %v1361_v50 = vsel %vm315_vm2, %v1360_v53, %v1266_v38 }
 0xc78   :  { %1364 = vrot.lane.b32.xlu0 %v1361_v50, %s2761_s1 }
 0xc7c   :  { %1338 = vrot.lane.b32.xlu0 %v1335_v55, %s2761_s1 }
 0xcde   :  { %v1337_v3 = vpop.permute.xlu1 %1336 }
 0xcdf   :  { %v1340_v56 = vsel %vm315_vm2, %v1337_v3, %v1205_v31 }
 0xce0   :  { %v1342_v57 = vmul.f32 %v1340_v56, %v2972_v13 }
 0xce2   :  { %1346 = vrot.lane.b32.xlu1 %v1342_v57, %s2763_s29 }
 0xce6   :  { %v1363_v58 = vpop.permute.xlu1 %1362 }
 0xce7   :  { %v1366_v59 = vsel %vm315_vm2, %v1363_v58, %v1263_v35 }
 0xce8   :  { %v1368_v61 = vmul.f32 %v1366_v59, %v2972_v13 }
 0xcea   :  { %1372 = vrot.lane.b32.xlu1 %v1368_v61, %s2763_s29  ;;  %v1365_v62 = vpop.permute.xlu0 %1364 }
 0xceb   :  { %v1367_v63 = vsel %vm315_vm2, %v1365_v62, %v1266_v38 }
 0xcec   :  { %v1369_v2 = vmul.f32 %v1367_v63, %v2965_v5 }
 0xcee   :  { %1374 = vrot.lane.b32.xlu0 %v1369_v2, %s2763_s29  ;;  %v1339_v4 = vpop.permute.xlu0 %1338 }
 0xcef   :  { %v1341_v6 = vsel %vm315_vm2, %v1339_v4, %v1208_v33 }
 0xcf0   :  { %v1343_v7 = vmul.f32 %v1341_v6, %v2965_v5 }
 0xcf2   :  { %1348 = vrot.lane.b32.xlu0 %v1343_v7, %s2763_s29 }
 0xd54   :  { %v1347_v0 = vpop.permute.xlu1 %1346 }
 0xd55   :  { %v1352_v13 = vadd.f32 %v1347_v0, %v1328_v8 }
 0xd57   :  { %v1380_v9 = vmul.f32 %v2996_v26, %v1352_v13  ;;  %v1495_v10 = vmul.f32 %v3001_v27, %v1352_v13 }
 0xd59   :  { %v1382_v11 = vmul.f32 0.25, %v1380_v9  ;;  %v1497_v12 = vmul.f32 0.25, %v1495_v10 }
 0xd5b   :  { %2563 = vmatprep.mubr.msk.f32.mxu1 %vm96_vm0, %v1382_v11  ;;  %2570 = vmatprep.mubr.msk.f32.mxu0 %vm96_vm0, %v1497_v12  ;;  %v1493_v11 = vmul.f32 %v3034_v48, %v3238_v40  ;;  %v2664_v40 = vld [vmem:[%s3463_s12 + $0x10] sm:$0xff]  }
 0xd5c   :  { %v1373_v1 = vpop.permute.xlu1 %1372 }
 0xd5d   :  { %v1378_v18 = vadd.f32 %v1373_v1, %v1354_v15 }
 0xd60   :  { %v1375_v5 = vpop.permute.xlu0 %1374 }
 0xd61   :  { %v1379_v17 = vadd.f32 %v1375_v5, %v1355_v14 }
 0xd63   :  { %2559 = vmatprep.subr.msk.mxu1 %vm96_vm0, %v1379_v17  ;;  %2566 = vmatprep.subr.msk.mxu0 %vm96_vm0, %v1379_v17 }
 0xd64   :  { %v1349_v21 = vpop.permute.xlu0 %1348  ;;  %2560 = vmatpush3.xpose.msk.msra.mxu1 %vm96_vm0, %v1379_v17  ;;  %2567 = vmatpush3.xpose.msk.msra.mxu0 %vm96_vm0, %v1379_v17 }
 0xd65   :  { %v1353_v23 = vadd.f32 %v1349_v21, %v1329_v19  ;;  %2561 = vmatprep.subr.msk.mxu1 %vm96_vm0, %v1378_v18  ;;  %2568 = vmatprep.subr.msk.mxu0 %vm96_vm0, %v1378_v18 }
 0xd67   :  { %v1381_v24 = vmul.f32 %v2996_v26, %v1353_v23  ;;  %v1496_v25 = vmul.f32 %v3001_v27, %v1353_v23  ;;  %v3291_v26 = vmul.f32 %v3034_v48, %v3240_v43  ;;  %v2663_v48 = vld [vmem:[%s3463_s12 + $0x18] sm:$0xff]  }
 0xd68   :  { %2562 = vmatpush3.xpose.msk.msra.mxu1 %vm96_vm0, %v1378_v18  ;;  %2569 = vmatpush3.xpose.msk.msra.mxu0 %vm96_vm0, %v1378_v18 }
 0xd69   :  { %v1383_v20 = vmul.f32 0.25, %v1381_v24  ;;  %v1498_v28 = vmul.f32 0.25, %v1496_v25  ;;  %2573 = vmatprep.subr.mxu1 %v1603_v22  ;;  %2587 = vmatprep.subr.bf16.mxu0 %v2759_v16 }
 0xd6b   :  { %2564 = vmatmul.mubr.msk.f32.vlgmr.msra.gmra.mxu1 %vm96_vm0, %v1383_v20  ;;  %2571 = vmatmul.mubr.msk.f32.vlgmr.msra.gmra.mxu0 %vm96_vm0, %v1498_v28  ;;  %v2271_v28 = vld [vmem:[%s3486_s2 + $0x88] sm:$0xff] }
 0xd6c   :  { %2574 = vmatpush3.msra.mxu1 %v1603_v22  ;;  %2591 = vmatprep.mubr.msk.bf16.mxu0 %vm2760_vm1, %v2759_v16  ;;  %v2270_v22 = vld [vmem:[%s3486_s2 + $0x80] sm:$0xff] }
 0xd6d   :  { %2575 = vmatprep.subr.mxu1 %v1602_v29  ;;  %2588 = vmatpush3.bf16.msra.mxu0 %v2663_v48  ;;  %v2673_v48 = vld [vmem:[%s3467_s16 + $0x48] sm:$0xff]  }
 0xd6e   :  { %2576 = vmatpush3.msra.mxu1 %v1602_v29  ;;  %2589 = vmatprep.subr.bf16.mxu0 %v2759_v16 }
 0xd6f   :  { %2580 = vmatprep.subr.mxu1 %v3291_v26 }
 0xd71   :  { %2590 = vmatpush3.bf16.msra.mxu0 %v2664_v40  ;;  %v2674_v40 = vld [vmem:[%s3467_s16 + $0x40] sm:$0xff]  }
 0xd72   :  { %2603 = vmatprep.subr.bf16.mxu0 %v2759_v16 }
 0xe2b   :  { %v2565_v27 = vpop.f32.mrf.mxu1  ;;  %v2572_v30 = vpop.f32.mrf.mxu0 }
 0xe2c   :  { %v1577_v42 = vadd.f32 %v2572_v30, %v3046_v51  ;;  %v1468_v38 = vadd.f32 %v2565_v27, %v3046_v51 }
 0xe2d   :  { %v1462_v31 = vpop.f32.mrf.mxu1  ;;  %v1571_v32 = vpop.f32.mrf.mxu0 }
 0xe2e   :  { %v1572_v33 = vadd.f32 %v1571_v32, %v3051_v54  ;;  %v1583_v34 = vsel %vm470_vm3, %v1577_v42, -inf  ;;  %v1463_v35 = vadd.f32 %v1462_v31, %v3051_v54  ;;  %v1474_v41 = vsel %vm470_vm3, %v1468_v38, -inf }
 0xe2f   :  { %1584 = vmax.xlane.f32.xlu1 %v1583_v34 }
 0xe30   :  { %v1580_v36 = vsel %vm470_vm3, %v1572_v33, -inf  ;;  %v1471_v39 = vsel %vm470_vm3, %v1463_v35, -inf }
 0xe31   :  { %1581 = vmax.xlane.f32.xlu0 %v1580_v36 }
 0xe35   :  { %1472 = vmax.xlane.f32.xlu0 %v1471_v39 }
 0xe39   :  { %1475 = vmax.xlane.f32.xlu0 %v1474_v41 }
 0xeb8   :  { %v1585_v43 = vpop.xlane.xlu1 %1584 }
 0xeb9   :  { %v1587_v44 = vsub.f32 %v1577_v42, %v1585_v43 }
 0xeba   :  { %v1582_v45 = vpop.xlane.xlu0 %1581 }
 0xebb   :  { %v1590_v47 = vmul.f32 1.442695, %v1587_v44  ;;  %v1586_v60 = vsub.f32 %v1572_v33, %v1582_v45  ;;  %v2665_v44 = vld [vmem:[%s3465_s14 + $0x18] sm:$0xff]   ;;  %v2666_v45 = vld [vmem:[%s3465_s14 + $0x10] sm:$0xff]  }
 0xebd   :  { %2709 = vpow2.f32 %v1590_v47  ;;  %v1588_v49 = vmul.f32 1.442695, %v1586_v60 }
 0xebe   :  { %v1473_v52 = vpop.xlane.xlu0 %1472 }
 0xebf   :  { %2711 = vpow2.f32 %v1588_v49  ;;  %v1477_v54 = vsub.f32 %v1463_v35, %v1473_v52 }
 0xec1   :  { %v1479_v53 = vmul.f32 1.442695, %v1477_v54 }
 0xec2   :  { %v1476_v50 = vpop.xlane.xlu0 %1475 }
 0xec3   :  { %2713 = vpow2.f32 %v1479_v53  ;;  %v1478_v51 = vsub.f32 %v1468_v38, %v1476_v50 }
 0xec5   :  { %v1481_v55 = vmul.f32 1.442695, %v1478_v51  ;;  %v2321_v51 = vld [vmem:[%s3464_s13 + $0x1] ss:$0 sm:$0xff] }
 0xec7   :  { %2715 = vpow2.f32 %v1481_v55  ;;  %v2274_v55 = vld [vmem:[%s3486_s2 + $0xa0] sm:$0xff] }
 0xeca   :  { %v2710_v3 = vpop.eup %2709 }
 0xecb   :  { %v1595_v56 = vsel %vm470_vm3, %v2710_v3, 0.0 }
 0xecc   :  { %v2712_v57 = vpop.eup %2711  ;;  %1596 = vadd.xlane.f32.xlu1 %v1595_v56  ;;  %v2275_v56 = vld [vmem:[%s3486_s2 + $0xa8] sm:$0xff] }
 0xecd   :  { %v1592_v58 = vsel %vm470_vm3, %v2712_v57, 0.0 }
 0xece   :  { %1593 = vadd.xlane.f32.xlu0 %v1592_v58  ;;  %v1868_v58 = vadd.f32 1.0, %v2274_v55 }
 0xed0   :  { %v2714_v59 = vpop.eup %2713 }
 0xed1   :  { %v1483_v61 = vsel %vm470_vm3, %v2714_v59, 0.0 }
 0xed2   :  { %1484 = vadd.xlane.f32.xlu0 %v1483_v61 }
 0xed4   :  { %v2716_v62 = vpop.eup %2715 }
 0xed5   :  { %v1486_v63 = vsel %vm470_vm3, %v2716_v62, 0.0 }
 0xed6   :  { %1487 = vadd.xlane.f32.xlu1 %v1486_v63 }
 0xf55   :  { %v1597_v2 = vpop.xlane.xlu1 %1596 }
 0xf56   :  { %2717 = vrcp.f32 %v1597_v2 }
 0xf57   :  { %v1594_v4 = vpop.xlane.xlu0 %1593 }
 0xf58   :  { %2719 = vrcp.f32 %v1594_v4  ;;  %v2272_v4 = vld [vmem:[%s3486_s2 + $0x90] sm:$0xff] }
 0xf5b   :  { %v1485_v6 = vpop.xlane.xlu0 %1484 }
 0xf5c   :  { %2721 = vrcp.f32 %v1485_v6  ;;  %v2273_v6 = vld [vmem:[%s3486_s2 + $0x98] sm:$0xff] }
 0xf5f   :  { %v1488_v7 = vpop.xlane.xlu1 %1487 }
 0xf60   :  { %2723 = vrcp.f32 %v1488_v7 }
 0xf63   :  { %v2718_v8 = vpop.eup %2717 }
 0xf64   :  { %v1601_v9 = vmul.f32 %v2718_v8, %v2710_v3 }
 0xf65   :  { %v2720_v0 = vpop.eup %2719 }
 0xf66   :  { %v1599_v13 = vmul.f32 %v2720_v0, %v2712_v57 }
 0xf68   :  { %2577 = vmatprep.mubr.msk.f32.mxu1 %vm470_vm3, %v1599_v13 }
 0xf69   :  { %v2722_v10 = vpop.eup %2721  ;;  %2578 = vmatmul.mubr.msk.f32.vlgmr.msra.gmra.mxu1 %vm470_vm3, %v1601_v9  ;;  %v2667_v9 = vld [vmem:[%s3467_s16 + $0x78] sm:$0xff]  }
 0xf6a   :  { %2581 = vmatpush3.msra.mxu1 %v3291_v26  ;;  %v1490_v12 = vmul.f32 %v2722_v10, %v2714_v59  ;;  %v2668_v10 = vld [vmem:[%s3467_s16 + $0x70] sm:$0xff]  }
 0xf6b   :  { %2582 = vmatprep.subr.mxu1 %v1493_v11 }
 0xf6c   :  { %2583 = vmatpush3.msra.mxu1 %v1493_v11  ;;  %2584 = vmatprep.mubr.msk.f32.mxu1 %vm470_vm3, %v1490_v12  ;;  %v2669_v11 = vld [vmem:[%s3467_s16 + $0x68] sm:$0xff]   ;;  %v2670_v12 = vld [vmem:[%s3467_s16 + $0x60] sm:$0xff]  }
 0xf6d   :  { %v2724_v14 = vpop.eup %2723  ;;  %2595 = vmatprep.subr.bf16.mxu1 %v2759_v16 }
 0xf6e   :  { %v1492_v1 = vmul.f32 %v2724_v14, %v2716_v62  ;;  %v1869_v62 = vadd.f32 1.0, %v2275_v56  ;;  %v2671_v14 = vld [vmem:[%s3467_s16 + $0x58] sm:$0xff]  }
 0xf70   :  { %2585 = vmatmul.mubr.msk.f32.vlgmr.msra.gmra.mxu1 %vm470_vm3, %v1492_v1  ;;  %v2672_v1 = vld [vmem:[%s3467_s16 + $0x50] sm:$0xff]  }
 0xf71   :  { %2599 = vmatprep.mubr.msk.bf16.mxu1 %vm2760_vm1, %v2759_v16  ;;  %2596 = vmatpush3.bf16.msra.mxu1 %v2665_v44  ;;  %v2276_v44 = vld [vmem:[%s3486_s2 + $0xb0] sm:$0xff] }
 0xf72   :  { %2597 = vmatprep.subr.bf16.mxu1 %v2759_v16 }
 0xf75   :  { %2598 = vmatpush3.bf16.msra.mxu1 %v2666_v45 }
 0xf76   :  { %2623 = vmatprep.subr.bf16.mxu1 %v2759_v16 }
0x1029   :  { %v2579_v5 = vpop.f32.mrf.mxu1 }
0x102b   :  { %v1676_v15 = vpop.f32.mrf.mxu1 }
0x1030   :  { %v2586_v17 = vpop.f32.mrf.mxu1 }
0x1031   :  { %v1763_v19 = vadd.f32 %v2586_v17, %v2579_v5  ;;  %v2327_v5 = vld [vmem:[%s3466_s15 + $0x1] ss:$0 sm:$0xff] }
0x1032   :  { %v1757_v18 = vpop.f32.mrf.mxu1 }
0x1033   :  { %v1758_v21 = vadd.f32 %v1757_v18, %v1676_v15 }
0x1035   :  { %v1766_v23 = vpack.c.bf16 %v1763_v19, %v1758_v21 }
0x1037   :  { %2592 = vmatmul.mubr.msk.bf16.vlgmr.msra.gmra.mxu0 %vm96_vm0, %v1766_v23 }
0x1038   :  { %2619 = vmatprep.mubr.msk.bf16.mxu0 %vm2760_vm1, %v2759_v16  ;;  %2604 = vmatpush3.bf16.msra.mxu0 %v2667_v9 }
0x1039   :  { %2605 = vmatprep.subr.bf16.mxu0 %v2759_v16 }
0x103c   :  { %2606 = vmatpush3.bf16.msra.mxu0 %v2668_v10 }
0x103d   :  { %2607 = vmatprep.subr.bf16.mxu0 %v2759_v16 }
0x1040   :  { %2608 = vmatpush3.bf16.msra.mxu0 %v2669_v11 }
0x1041   :  { %2609 = vmatprep.subr.bf16.mxu0 %v2759_v16 }
0x1044   :  { %2610 = vmatpush3.bf16.msra.mxu0 %v2670_v12 }
0x1045   :  { %2611 = vmatprep.subr.bf16.mxu0 %v2759_v16 }
0x1048   :  { %2612 = vmatpush3.bf16.msra.mxu0 %v2671_v14 }
0x1049   :  { %2613 = vmatprep.subr.bf16.mxu0 %v2759_v16 }
0x104c   :  { %2614 = vmatpush3.bf16.msra.mxu0 %v2672_v1  ;;  %v2357_v1 = vld [vmem:[%s3469_s18] ss:$0 sm:$0xff] }
0x104d   :  { %2615 = vmatprep.subr.bf16.mxu0 %v2759_v16 }
0x1050   :  { %2616 = vmatpush3.bf16.msra.mxu0 %v2673_v48  ;;  %v2358_v48 = vld [vmem:[%s3490_s30 + $0x10] sm:$0xff] }
0x1051   :  { %2617 = vmatprep.subr.bf16.mxu0 %v2759_v16 }
0x1054   :  { %2618 = vmatpush3.bf16.msra.mxu0 %v2674_v40 }
0x10f7   :  { %v1821_v24 = vpop.f32.mrf.mxu0 }
0x10f8   :  { %v1828_v25 = vmul.f32 %v2270_v22, %v1821_v24 }
0x10f9   :  { %v2593_v20 = vpop.f32.mrf.mxu0 }
0x10fa   :  { %v3334_v29 = vadd.f32 %v1828_v25, %v3176_v37 }
0x10fb   :  { %v1824_v26 = vpop.f32.mrf.mxu0 }
0x10fc   :  { %v1829_v27 = vmul.f32 %v2271_v28, %v1824_v26  ;;  %v1834_v30 = vsel %vm96_vm0, %v3334_v29, 0.0 }
0x10fd   :  { %1835 = vadd.xlane.f32.xlu0 %v1834_v30  ;;  %v2594_v42 = vpop.f32.mrf.mxu0 }
0x10fe   :  { %v3339_v31 = vadd.f32 %v1829_v27, %v3181_v46 }
0x1100   :  { %v1837_v32 = vsel %vm96_vm0, %v3339_v31, 0.0 }
0x1101   :  { %1838 = vadd.xlane.f32.xlu1 %v1837_v32 }
0x1186   :  { %v1836_v33 = vpop.xlane.xlu0 %1835 }
0x1187   :  { %v1840_v34 = vmul.f32 0.03125, %v1836_v33 }
0x1189   :  { %v1842_v35 = vsub.f32 %v3334_v29, %v1840_v34 }
0x118a   :  { %v1839_v37 = vpop.xlane.xlu1 %1838 }
0x118b   :  { %v1841_v36 = vmul.f32 0.03125, %v1839_v37  ;;  %v1844_v38 = vmul.f32 %v1842_v35, %v1842_v35 }
0x118d   :  { %v1843_v39 = vsub.f32 %v3339_v31, %v1841_v36  ;;  %v1846_v41 = vsel %vm96_vm0, %v1844_v38, 0.0 }
0x118e   :  { %1847 = vadd.xlane.f32.xlu0 %v1846_v41 }
0x118f   :  { %v1845_v43 = vmul.f32 %v1843_v39, %v1843_v39 }
0x1191   :  { %v1849_v46 = vsel %vm96_vm0, %v1845_v43, 0.0 }
0x1192   :  { %1850 = vadd.xlane.f32.xlu1 %v1849_v46  ;;  %v2348_v46 = vld [vmem:[%s3468_s17 + $0x1] ss:$0 sm:$0xff] }
0x1217   :  { %v1848_v47 = vpop.xlane.xlu0 %1847 }
0x1218   :  { %v1852_v60 = vmul.f32 0.03125, %v1848_v47 }
0x121a   :  { %v1854_v49 = vadd.f32 1e-05, %v1852_v60 }
0x121b   :  { %v1851_v52 = vpop.xlane.xlu1 %1850 }
0x121c   :  { %2725 = vrsqrt.f32 %v1854_v49  ;;  %v1853_v54 = vmul.f32 0.03125, %v1851_v52  ;;  %v2277_v52 = vld [vmem:[%s3486_s2 + $0xb8] sm:$0xff] }
0x121e   :  { %v1855_v53 = vadd.f32 1e-05, %v1853_v54 }
0x1220   :  { %2727 = vrsqrt.f32 %v1855_v53 }
0x1229   :  { %v2726_v50 = vpop.eup %2725 }
0x122a   :  { %v1858_v3 = vmul.f32 %v2726_v50, %v1842_v35 }
0x122c   :  { %v1866_v57 = vmul.f32 %v2321_v51, %v1858_v3 }
0x122d   :  { %v2728_v59 = vpop.eup %2727 }
0x122e   :  { %v1859_v61 = vmul.f32 %v2728_v59, %v1843_v39  ;;  %v1870_v2 = vmul.f32 %v1868_v58, %v1866_v57 }
0x1230   :  { %v1867_v63 = vmul.f32 %v2321_v51, %v1859_v61  ;;  %v1872_v8 = vadd.f32 %v2272_v4, %v1870_v2 }
0x1232   :  { %v1871_v7 = vmul.f32 %v1869_v62, %v1867_v63 }
0x1234   :  { %v1873_v0 = vadd.f32 %v2273_v6, %v1871_v7 }
0x1236   :  { %v1874_v13 = vpack.c.bf16 %v1873_v0, %v1872_v8  ;;  %v2676_v8 = vld [vmem:[%s3470_s19] sm:$0xff]  }
0x1238   :  { %2600 = vmatmul.mubr.msk.bf16.vlgmr.msra.gmra.mxu1 %vm96_vm0, %v1874_v13 }
0x1239   :  { %2627 = vmatprep.mubr.msk.bf16.mxu1 %vm2760_vm1, %v2759_v16 }
0x12f8   :  { %v1937_v15 = vpop.f32.mrf.mxu1 }
0x12f9   :  { %v1938_v17 = vadd.f32 %v2327_v5, %v1937_v15  ;;  %v2119_v15 = vadd.f32 1.0, %v2358_v48 }
0x12fa   :  { %v2601_v18 = vpop.f32.mrf.mxu1 }
0x12fb   :  { %v1946_v19 = vmul.f32 0.044715, %v1938_v17  ;;  %v1944_v37 = vmul.f32 0.5, %v1938_v17 }
0x12fc   :  { %v1940_v21 = vpop.f32.mrf.mxu1 }
0x12fd   :  { %v1948_v23 = vmul.f32 %v1946_v19, %v1938_v17  ;;  %v1941_v22 = vadd.f32 %v2327_v5, %v1940_v21 }
0x12fe   :  { %v2602_v24 = vpop.f32.mrf.mxu1 }
0x12ff   :  { %v1950_v25 = vmul.f32 %v1948_v23, %v1938_v17  ;;  %v1947_v20 = vmul.f32 0.044715, %v1941_v22  ;;  %v1945_v36 = vmul.f32 0.5, %v1941_v22  ;;  %v2124_v24 = vld [vmem:[%s3490_s30 + $0x8] sm:$0xff] }
0x1301   :  { %v1952_v28 = vadd.f32 %v1950_v25, %v1938_v17  ;;  %v1949_v26 = vmul.f32 %v1947_v20, %v1941_v22 }
0x1303   :  { %v1954_v27 = vmul.f32 0.7978846, %v1952_v28  ;;  %v1951_v30 = vmul.f32 %v1949_v26, %v1941_v22 }
0x1305   :  { %2729 = vtanh.f32 %v1954_v27  ;;  %v1953_v42 = vadd.f32 %v1951_v30, %v1941_v22  ;;  %v2123_v22 = vld [vmem:[%s3490_s30] sm:$0xff] }
0x1306   :  { %v2360_v27 = vld [vmem:[%s3471_s20] ss:$0 sm:$0xff] }
0x1307   :  { %v1955_v32 = vmul.f32 0.7978846, %v1953_v42 }
0x1309   :  { %2731 = vtanh.f32 %v1955_v32 }
0x1312   :  { %v2730_v33 = vpop.eup %2729 }
0x1313   :  { %v1958_v34 = vadd.f32 1.0, %v2730_v33 }
0x1315   :  { %v1960_v39 = vmul.f32 %v1958_v34, %v1944_v37 }
0x1316   :  { %v2732_v35 = vpop.eup %2731 }
0x1317   :  { %v1959_v38 = vadd.f32 1.0, %v2732_v35 }
0x1319   :  { %v1961_v41 = vmul.f32 %v1959_v38, %v1945_v36 }
0x131b   :  { %v1962_v43 = vpack.c.bf16 %v1961_v41, %v1960_v39 }
0x131d   :  { %2620 = vmatmul.mubr.bf16.vlgmr.msra.gmra.mxu0 %v1962_v43 }
0x13dd   :  { %v2070_v45 = vpop.f32.mrf.mxu0 }
0x13de   :  { %v2071_v47 = vadd.f32 %v2348_v46, %v2070_v45 }
0x13df   :  { %v2621_v60 = vpop.f32.mrf.mxu0 }
0x13e0   :  { %v2077_v49 = vmul.f32 %v2276_v44, %v2071_v47 }
0x13e1   :  { %v2073_v54 = vpop.f32.mrf.mxu0 }
0x13e2   :  { %v2074_v53 = vadd.f32 %v2348_v46, %v2073_v54  ;;  %v2079_v50 = vadd.f32 %v2077_v49, %v3334_v29 }
0x13e3   :  { %v2622_v51 = vpop.f32.mrf.mxu0 }
0x13e4   :  { %v2078_v55 = vmul.f32 %v2277_v52, %v2074_v53  ;;  %v2082_v3 = vsel %vm96_vm0, %v2079_v50, 0.0 }
0x13e5   :  { %2083 = vadd.xlane.f32.xlu0 %v2082_v3 }
0x13e6   :  { %v2080_v56 = vadd.f32 %v2078_v55, %v3339_v31  ;;  %v2675_v31 = vld [vmem:[%s3470_s19 + $0x8] sm:$0xff]  }
0x13e7   :  { %2624 = vmatpush3.bf16.msra.mxu1 %v2675_v31 }
0x13e8   :  { %v2085_v57 = vsel %vm96_vm0, %v2080_v56, 0.0  ;;  %2625 = vmatprep.subr.bf16.mxu1 %v2759_v16  ;;  %v2359_v16 = vld [vmem:[%s3490_s30 + $0x18] sm:$0xff] }
0x13e9   :  { %2086 = vadd.xlane.f32.xlu1 %v2085_v57  ;;  %v2120_v19 = vadd.f32 1.0, %v2359_v16 }
0x13eb   :  { %2626 = vmatpush3.bf16.msra.mxu1 %v2676_v8 }
0x146e   :  { %v2084_v58 = vpop.xlane.xlu0 %2083 }
0x146f   :  { %v2088_v59 = vmul.f32 0.03125, %v2084_v58 }
0x1471   :  { %v2090_v61 = vsub.f32 %v2079_v50, %v2088_v59 }
0x1472   :  { %v2087_v62 = vpop.xlane.xlu1 %2086 }
0x1473   :  { %v2089_v63 = vmul.f32 0.03125, %v2087_v62  ;;  %v2092_v2 = vmul.f32 %v2090_v61, %v2090_v61 }
0x1475   :  { %v2091_v4 = vsub.f32 %v2080_v56, %v2089_v63  ;;  %v2094_v6 = vsel %vm96_vm0, %v2092_v2, 0.0 }
0x1476   :  { %2095 = vadd.xlane.f32.xlu0 %v2094_v6 }
0x1477   :  { %v2093_v29 = vmul.f32 %v2091_v4, %v2091_v4 }
0x1479   :  { %v2097_v7 = vsel %vm96_vm0, %v2093_v29, 0.0 }
0x147a   :  { %2098 = vadd.xlane.f32.xlu1 %v2097_v7 }
0x14ff   :  { %v2096_v0 = vpop.xlane.xlu0 %2095 }
0x1500   :  { %v2100_v13 = vmul.f32 0.03125, %v2096_v0 }
0x1502   :  { %v2102_v9 = vadd.f32 1e-05, %v2100_v13 }
0x1503   :  { %v2099_v10 = vpop.xlane.xlu1 %2098 }
0x1504   :  { %2733 = vrsqrt.f32 %v2102_v9  ;;  %v2101_v11 = vmul.f32 0.03125, %v2099_v10 }
0x1506   :  { %v2103_v12 = vadd.f32 1e-05, %v2101_v11 }
0x1508   :  { %2735 = vrsqrt.f32 %v2103_v12 }
0x1511   :  { %v2734_v14 = vpop.eup %2733 }
0x1512   :  { %v2106_v40 = vmul.f32 %v2734_v14, %v2090_v61 }
0x1514   :  { %v2114_v5 = vmul.f32 %v2357_v1, %v2106_v40 }
0x1515   :  { %v2736_v17 = vpop.eup %2735 }
0x1516   :  { %v2107_v18 = vmul.f32 %v2736_v17, %v2091_v4  ;;  %v2121_v23 = vmul.f32 %v2119_v15, %v2114_v5 }
0x1518   :  { %v2115_v21 = vmul.f32 %v2357_v1, %v2107_v18  ;;  %v2125_v20 = vadd.f32 %v2123_v22, %v2121_v23 }
0x151a   :  { %v2122_v25 = vmul.f32 %v2120_v19, %v2115_v21 }
0x151c   :  { %v2126_v28 = vadd.f32 %v2124_v24, %v2122_v25 }
0x151e   :  { %v2127_v26 = vpack.c.bf16 %v2126_v28, %v2125_v20 }
0x1520   :  { %2628 = vmatmul.mubr.msk.bf16.vlgmr.msra.gmra.mxu1 %vm96_vm0, %v2127_v26 }
0x15e0   :  { %v2188_v30 = vpop.f32.mrf.mxu1 }
0x15e1   :  { %v2189_v42 = vadd.f32 %v2360_v27, %v2188_v30 }
0x15e2   :  { %v2629_v32 = vpop.f32.mrf.mxu1 }
0x15e3   :  { %2195 = vst [vmem:[#allocation2] sm:$0xff] %v2189_v42 }
0x15e4   :  { %v2191_v33 = vpop.f32.mrf.mxu1 }
0x15e5   :  { %v2192_v34 = vadd.f32 %v2360_v27, %v2191_v33 }
0x15e6   :  { %v2630_v35 = vpop.f32.mrf.mxu1 }
0x15e7   :  { %2196 = vst [vmem:[#allocation2 + $0x8] sm:$0xff] %v2192_v34 }
0x15e8   :  { %2748 = shalt.err (!%p2745_p4)
}
0x15e9   :  { %s2765_s25 = smov 128   ;;  %s2766_s20 = smov 8  }
0x15ea   :  { %2208 = dma.vmem_to_hbm [thread:$0]  %s2203_s23, 256, %s3472_s21, [#allocation3], %s2765_s25, %s2765_s25, %s2766_s20  }
0x15eb   :  { %2757 = dma.done.wait [#allocation3], 256  }
0x15ec   :  { %2758 = vsyncadd [#allocation3], 4294967040 }
0x15ed   :  { %2212 = vsyncpa [#allocation3], 1 }

</bundles_post_ra>
